<compile_context>
chip_gen: v6e
topology: v6e:2x2x1
jax: 0.10.0
libtpu: 0.0.40
codegen_flags: <defaults>
</compile_context>

<pallas_src>
import jax
import jax.numpy as jnp
from jax.experimental import pallas as pl
from jax.experimental.pallas import tpu as pltpu

LANE = 128
ROW_PAD = 32          # node-row padding (bf16 sublane-pack friendly)
BATCH_PAD = 8         # graph-row padding (f32 sublane)
VMEM = pl.BlockSpec(memory_space=pltpu.MemorySpace.VMEM)


def _round_up(x, m):
    return (x + m - 1) // m * m


# ---------------------------------------------------------------------------
# Fused forward kernel
# ---------------------------------------------------------------------------
def fused_forward_kernel(feat_ref, onto_ref, adj_ref, rdo_ref, misc_ref,
                         wstk_ref, wrel_ref, out_ref, msg_ref):
    f32, bf16 = jnp.float32, jnp.bfloat16
    n_pad, d = feat_ref.shape                      # (32, 128)
    num_rels = adj_ref.shape[1] // n_pad
    b_pad = rdo_ref.shape[0] // 3

    misc = misc_ref[...]                           # (8 + b_pad, 128) f32
    att_mask = misc[0:1, :]                        # -1e30 on lanes >= K*onto_dim
    sem_mask = misc[1:2, :]                        # 1.0 on sem-feature lanes
    b_o2e = misc[2:3, :]
    b1 = misc[3:4, :]
    b2 = misc[4:5, :]
    b_fc = misc[5:6, :]
    wfc_r = misc[6:7, :]                           # fc column for the relation block
    rel_oh = misc[8:8 + b_pad, :].astype(bf16)     # per-graph relation one-hot (exact)

    # ---- 1) ontology-attention entity init (expanded-lane softmax) ----
    onto = onto_ref[...]                           # (n_pad, 128) bf16, K slots on lanes
    scores = jnp.dot(onto, wstk_ref[0], preferred_element_type=f32) + att_mask
    m = jnp.max(scores, axis=-1, keepdims=True)
    e = jnp.exp(scores - m)
    atts = e * pl.reciprocal(jnp.sum(e, axis=-1, keepdims=True), approx=True)
    weighted = onto * atts.astype(bf16)            # = att_k/onto_dim * onto_k per lane
    ent = jax.nn.sigmoid(                          # 1/onto_dim compensated inside wstk[1]
        jnp.dot(weighted, wstk_ref[1], preferred_element_type=f32) + b_o2e)
    h0 = feat_ref[...] + ent * sem_mask            # g.ndata['init'] = [feat | ent_feats]

    # ---- 2) RGCN layers: one (n, 128)x(128, R*128) msg matmul + one adj matmul ----
    def rgcn_layer(h, wrel, wself, brow):
        hb = h.astype(bf16)
        msgs = jnp.dot(hb, wrel, preferred_element_type=f32).astype(bf16)   # (n, R*128)
        for r in range(num_rels):                  # static: column blocks -> row blocks
            msg_ref[r * n_pad:(r + 1) * n_pad, :] = msgs[:, r * d:(r + 1) * d]
        agg = jnp.dot(adj_ref[...], msg_ref[...], preferred_element_type=f32)
        agg = agg + jnp.dot(hb, wself, preferred_element_type=f32)
        return jnp.maximum(agg + brow, 0.0)

    h1 = rgcn_layer(h0, wrel_ref[0], wstk_ref[2], b1)
    h2 = rgcn_layer(h1, wrel_ref[1], wstk_ref[3], b2)

    # ---- 3) relation path: select-then-transform (one-hot commutes with tanh/matmul) ----
    rel0 = jnp.dot(rel_oh, wstk_ref[4], preferred_element_type=f32)          # rel_emb rows
    r1 = jnp.tanh(jnp.dot(rel0.astype(bf16), wstk_ref[5], preferred_element_type=f32))
    r2 = jnp.tanh(jnp.dot(r1.astype(bf16), wstk_ref[6], preferred_element_type=f32))
    rel_contrib = jnp.sum(r2 * wfc_r, axis=-1, keepdims=True)                # (b_pad, 1)

    # ---- 4) readout (mean|head|tail stacked) + fc ----
    S = rdo_ref[...]                                           # (3*b_pad, n_pad) bf16
    P1 = jnp.dot(S, h1.astype(bf16), preferred_element_type=f32)
    P2 = jnp.dot(S, h2.astype(bf16), preferred_element_type=f32)
    Q = (jnp.dot(P1.astype(bf16), wstk_ref[7], preferred_element_type=f32)
         + jnp.dot(P2.astype(bf16), wstk_ref[8], preferred_element_type=f32))
    out_s = (Q[0:b_pad, 0:1]                        # g_out block  (fc col 0)
             + Q[b_pad:2 * b_pad, 1:2]              # head block   (fc col 1)
             + Q[2 * b_pad:3 * b_pad, 2:3]          # tail block   (fc col 2)
             + rel_contrib)
    out_ref[...] = out_s + b_fc                     # (b_pad, 128) lane-dense store


# ---------------------------------------------------------------------------
# One-time parameter packing (hoisted out of the per-call path)
# ---------------------------------------------------------------------------
def prepare_params(params, k_slots):
    f32, bf16 = jnp.float32, jnp.bfloat16
    d = LANE
    num_rels = params["W_rel1"].shape[0]
    onto_dim, sem_dim = params["W_o2e"].shape
    inp_dim, emb_dim = params["W_self1"].shape
    feat_dim = inp_dim - sem_dim
    rel_dim = params["Wr1"].shape[1]
    e = emb_dim
    assert k_slots * onto_dim <= d and inp_dim <= d and emb_dim <= d and rel_dim <= d
    assert params["rel_emb"].shape[0] <= d

    lanes = jnp.arange(d)
    misc = jnp.zeros((8, d), f32)
    misc = misc.at[0].set(jnp.where(lanes < k_slots * onto_dim, 0.0, -1e30))
    misc = misc.at[1].set(((lanes >= feat_dim) & (lanes < inp_dim)).astype(f32))
    misc = misc.at[2, feat_dim:inp_dim].set(params["b_o2e"].reshape(-1))
    misc = misc.at[3, :emb_dim].set(params["b1"].reshape(-1))
    misc = misc.at[4, :emb_dim].set(params["b2"].reshape(-1))
    misc = misc.at[5].set(jnp.full((d,), params["b_fc"].reshape(-1)[0]))
    wfc = params["W_fc"][:, 0]                      # layout: [g_h1|g_h2|h_h1|h_h2|t_h1|t_h2|rel]
    misc = misc.at[6, :rel_dim].set(wfc[6 * e:6 * e + rel_dim])

    wstk = jnp.zeros((9, d, d), f32)
    w_att = params["w_att"].reshape(-1)             # (onto_dim,)
    for k in range(k_slots):
        r0 = k * onto_dim
        wstk = wstk.at[0, r0:r0 + onto_dim, r0:r0 + onto_dim].set(
            jnp.broadcast_to(w_att[:, None], (onto_dim, onto_dim)))
        wstk = wstk.at[1, r0:r0 + onto_dim, feat_dim:inp_dim].set(
            onto_dim * params["W_o2e"])             # 1/onto_dim softmax scale folded in
    wstk = wstk.at[2, :inp_dim, :emb_dim].set(params["W_self1"])
    wstk = wstk.at[3, :emb_dim, :emb_dim].set(params["W_self2"])
    wstk = wstk.at[4, :params["rel_emb"].shape[0], :inp_dim].set(params["rel_emb"])
    wstk = wstk.at[5, :inp_dim, :rel_dim].set(params["Wr1"])
    wstk = wstk.at[6, :rel_dim, :rel_dim].set(params["Wr2"])
    wstk = wstk.at[7, :emb_dim, 0].set(wfc[0:e])            # g_out  / h1 half
    wstk = wstk.at[7, :emb_dim, 1].set(wfc[2 * e:3 * e])    # head   / h1 half
    wstk = wstk.at[7, :emb_dim, 2].set(wfc[4 * e:5 * e])    # tail   / h1 half
    wstk = wstk.at[8, :emb_dim, 0].set(wfc[e:2 * e])        # g_out  / h2 half
    wstk = wstk.at[8, :emb_dim, 1].set(wfc[3 * e:4 * e])    # head   / h2 half
    wstk = wstk.at[8, :emb_dim, 2].set(wfc[5 * e:6 * e])    # tail   / h2 half

    wrel = jnp.zeros((2, d, num_rels * d), f32)
    for r in range(num_rels):
        wrel = wrel.at[0, :inp_dim, r * d:r * d + emb_dim].set(params["W_rel1"][r])
        wrel = wrel.at[1, :emb_dim, r * d:r * d + emb_dim].set(params["W_rel2"][r])

    return {"misc": misc, "wstk": wstk.astype(bf16), "wrel": wrel.astype(bf16),
            "onto_emb": params["onto_emb"].astype(f32)}


# ---------------------------------------------------------------------------
# Per-call wrapper: lay out per-graph data, one pallas_call, slice result.
# ---------------------------------------------------------------------------
def graph_classifier_forward(prepped, feat, onto_ids, adj, mean_mat,
                             head_mat, tail_mat, rel_labels):
    f32, bf16 = jnp.float32, jnp.bfloat16
    d = LANE
    num_rels, n, _ = adj.shape
    b = mean_mat.shape[0]
    n_pad = _round_up(n, ROW_PAD)
    b_pad = _round_up(b, BATCH_PAD)

    feat_pad = jnp.pad(feat.astype(f32), ((0, n_pad - n), (0, d - feat.shape[1])))

    onto_e = prepped["onto_emb"][onto_ids]                       # (n, K, onto_dim) gather
    ksl = onto_e.shape[1] * onto_e.shape[2]
    onto_packed = jnp.pad(onto_e.reshape(n, ksl),
                          ((0, n_pad - n), (0, d - ksl))).astype(bf16)

    # dense per-relation adjacency -> (n_pad, R*n_pad), relation-major contraction
    adj_p = jnp.pad(adj.astype(f32), ((0, 0), (0, n_pad - n), (0, n_pad - n)))
    adj2 = adj_p.transpose(1, 0, 2).reshape(n_pad, num_rels * n_pad).astype(bf16)

    def pad_sel(x):
        return jnp.pad(x.astype(f32), ((0, b_pad - b), (0, n_pad - n)))
    rdo = jnp.concatenate([pad_sel(mean_mat), pad_sel(head_mat), pad_sel(tail_mat)],
                          axis=0).astype(bf16)                   # (3*b_pad, n_pad)

    rel_oh = jnp.pad(jax.nn.one_hot(rel_labels, d, dtype=f32), ((0, b_pad - b), (0, 0)))
    misc = jnp.concatenate([prepped["misc"], rel_oh], axis=0)    # (8 + b_pad, 128) f32

    out_pad = pl.pallas_call(
        fused_forward_kernel,
        out_shape=jax.ShapeDtypeStruct((b_pad, d), f32),
        in_specs=[VMEM] * 7,
        out_specs=VMEM,
        scratch_shapes=[pltpu.VMEM((num_rels * n_pad, d), bf16)],   # stacked messages
    )(feat_pad, onto_packed, adj2, rdo, misc, prepped["wstk"], prepped["wrel"])

    return out_pad[:b, :1]


# ---------------------------------------------------------------------------
# Deterministic synthetic setup
# ---------------------------------------------------------------------------
def make_params(key, *, num_rels, num_ontos, inp_dim, emb_dim, onto_emb_dim,
                sem_dim, rel_emb_dim, num_gcn_layers):
    ks = jax.random.split(key, 16)
    s = 0.1
    p = {}
    p["rel_emb"] = s * jax.random.normal(ks[0], (num_rels + 1, inp_dim), jnp.float32)
    p["rel_emb"] = p["rel_emb"].at[num_rels].set(0.0)         # padding_idx
    p["onto_emb"] = s * jax.random.normal(ks[1], (num_ontos + 1, onto_emb_dim), jnp.float32)
    p["onto_emb"] = p["onto_emb"].at[num_ontos].set(0.0)      # padding_idx
    p["w_att"] = s * jax.random.normal(ks[2], (1, onto_emb_dim), jnp.float32)
    p["W_o2e"] = s * jax.random.normal(ks[3], (onto_emb_dim, sem_dim), jnp.float32)
    p["b_o2e"] = jnp.zeros((1, sem_dim), jnp.float32)
    p["W_rel1"] = s * jax.random.normal(ks[4], (num_rels, inp_dim, emb_dim), jnp.float32)
    p["W_self1"] = s * jax.random.normal(ks[5], (inp_dim, emb_dim), jnp.float32)
    p["b1"] = jnp.zeros((1, emb_dim), jnp.float32)
    p["W_rel2"] = s * jax.random.normal(ks[6], (num_rels, emb_dim, emb_dim), jnp.float32)
    p["W_self2"] = s * jax.random.normal(ks[7], (emb_dim, emb_dim), jnp.float32)
    p["b2"] = jnp.zeros((1, emb_dim), jnp.float32)
    p["Wr1"] = s * jax.random.normal(ks[8], (inp_dim, rel_emb_dim), jnp.float32)
    p["Wr2"] = s * jax.random.normal(ks[9], (rel_emb_dim, rel_emb_dim), jnp.float32)
    fc_in = 3 * num_gcn_layers * emb_dim + rel_emb_dim        # add_ht_emb=True
    p["W_fc"] = s * jax.random.normal(ks[10], (fc_in, 1), jnp.float32)
    p["b_fc"] = jnp.zeros((1, 1), jnp.float32)
    return p


if __name__ == "__main__":
    # small config
    B = 2                # graphs per batch
    NPG = 8              # nodes per graph
    N = B * NPG          # total nodes
    K = 4                # ontology slots per node
    num_rels = 4
    num_ontos = 10
    feat_dim = 8
    sem_dim = 8
    inp_dim = feat_dim + sem_dim     # 16
    emb_dim = 16
    onto_emb_dim = 16
    rel_emb_dim = 16
    L = 2                # num_gcn_layers

    key = jax.random.PRNGKey(0)
    kp, kf, ko, ke, kr = jax.random.split(key, 5)

    params = make_params(kp, num_rels=num_rels, num_ontos=num_ontos,
                         inp_dim=inp_dim, emb_dim=emb_dim,
                         onto_emb_dim=onto_emb_dim, sem_dim=sem_dim,
                         rel_emb_dim=rel_emb_dim, num_gcn_layers=L)

    # node data
    feat = jax.random.normal(kf, (N, feat_dim), jnp.float32)          # g.ndata['feat']
    onto_ids = jax.random.randint(ko, (N, K), 0, num_ontos + 1)       # g.ndata['onto']

    # dense per-relation adjacency (row-normalized), deterministic random edges
    raw = jax.random.uniform(ke, (num_rels, N, N))
    block = jnp.zeros((N, N), jnp.float32)
    for gb in range(B):                                               # edges only within a graph
        block = block.at[gb * NPG:(gb + 1) * NPG, gb * NPG:(gb + 1) * NPG].set(1.0)
    adj = (raw < 0.3).astype(jnp.float32) * block[None]
    deg = jnp.clip(jnp.sum(adj, axis=-1, keepdims=True), 1.0, None)
    adj = adj / deg

    # readout / gather matrices: node 0 of each graph is head (id==1), node 1 is tail (id==2)
    mean_mat = jnp.zeros((B, N), jnp.float32)
    head_mat = jnp.zeros((B, N), jnp.float32)
    tail_mat = jnp.zeros((B, N), jnp.float32)
    for gb in range(B):
        mean_mat = mean_mat.at[gb, gb * NPG:(gb + 1) * NPG].set(1.0 / NPG)
        head_mat = head_mat.at[gb, gb * NPG + 0].set(1.0)
        tail_mat = tail_mat.at[gb, gb * NPG + 1].set(1.0)

    rel_labels = jax.random.randint(kr, (B,), 0, num_rels)

    # one-time parameter packing (outside the per-call path), then jitted forward
    prepped = prepare_params(params, K)
    forward = jax.jit(graph_classifier_forward)
    out = forward(prepped, feat, onto_ids, adj, mean_mat,
                  head_mat, tail_mat, rel_labels)
    out = jax.block_until_ready(out)
    assert out.shape == (B, 1) and out.dtype == jnp.float32
    print("KERNEL_OK")
</pallas_src>

<mosaic_0001>
module attributes {stable_mosaic.version = 11 : i64} {
  func.func @fused_forward_kernel(%arg0: memref<32x128xf32, #tpu.memory_space<vmem>>, %arg1: memref<32x128xbf16, #tpu.memory_space<vmem>>, %arg2: memref<32x128xbf16, #tpu.memory_space<vmem>>, %arg3: memref<24x32xbf16, #tpu.memory_space<vmem>>, %arg4: memref<16x128xf32, #tpu.memory_space<vmem>>, %arg5: memref<9x128x128xbf16, #tpu.memory_space<vmem>>, %arg6: memref<2x128x512xbf16, #tpu.memory_space<vmem>>, %arg7: memref<8x128xf32, #tpu.memory_space<vmem>>, %arg8: memref<128x128xbf16, #tpu.memory_space<vmem>>) attributes {dimension_semantics = [], scalar_prefetch = 0 : i64, scratch_operands = 1 : i64, tpu.core_type = #tpu.core_type<tc>} {
    %c0 = arith.constant 0 : index
    %c0_0 = arith.constant 0 : index
    %0 = vector.load %arg4[%c0, %c0_0] : memref<16x128xf32, #tpu.memory_space<vmem>>, vector<16x128xf32>
    %1 = vector.extract_strided_slice %0 {offsets = [0, 0], sizes = [1, 128], strides = [1, 1]} : vector<16x128xf32> to vector<1x128xf32>
    %2 = vector.extract_strided_slice %0 {offsets = [1, 0], sizes = [1, 128], strides = [1, 1]} : vector<16x128xf32> to vector<1x128xf32>
    %3 = vector.extract_strided_slice %0 {offsets = [2, 0], sizes = [1, 128], strides = [1, 1]} : vector<16x128xf32> to vector<1x128xf32>
    %4 = vector.extract_strided_slice %0 {offsets = [3, 0], sizes = [1, 128], strides = [1, 1]} : vector<16x128xf32> to vector<1x128xf32>
    %5 = vector.extract_strided_slice %0 {offsets = [4, 0], sizes = [1, 128], strides = [1, 1]} : vector<16x128xf32> to vector<1x128xf32>
    %6 = vector.extract_strided_slice %0 {offsets = [5, 0], sizes = [1, 128], strides = [1, 1]} : vector<16x128xf32> to vector<1x128xf32>
    %7 = vector.extract_strided_slice %0 {offsets = [6, 0], sizes = [1, 128], strides = [1, 1]} : vector<16x128xf32> to vector<1x128xf32>
    %8 = vector.extract_strided_slice %0 {offsets = [8, 0], sizes = [8, 128], strides = [1, 1]} : vector<16x128xf32> to vector<8x128xf32>
    %9 = arith.truncf %8 : vector<8x128xf32> to vector<8x128xbf16>
    %c0_1 = arith.constant 0 : index
    %c0_2 = arith.constant 0 : index
    %10 = vector.load %arg1[%c0_1, %c0_2] : memref<32x128xbf16, #tpu.memory_space<vmem>>, vector<32x128xbf16>
    %c0_3 = arith.constant 0 : index
    %c0_4 = arith.constant 0 : index
    %c0_5 = arith.constant 0 : index
    %11 = vector.load %arg5[%c0_3, %c0_4, %c0_5] : memref<9x128x128xbf16, #tpu.memory_space<vmem>>, vector<1x128x128xbf16>
    %12 = vector.shape_cast %11 : vector<1x128x128xbf16> to vector<128x128xbf16>
    %cst = arith.constant dense<0.000000e+00> : vector<32x128xf32>
    %13 = tpu.matmul %10, %12, %cst {dimension_numbers = #tpu.dot_dimension_numbers<[1], [0], [0], [1], [0, 0, 1, 1], [], []>} : vector<32x128xbf16>, vector<128x128xbf16>, vector<32x128xf32> -> vector<32x128xf32>
    %14 = vector.broadcast %1 : vector<1x128xf32> to vector<32x128xf32>
    %15 = arith.addf %13, %14 : vector<32x128xf32>
    %cst_6 = arith.constant dense<0xFF800000> : vector<32xf32>
    %16 = vector.multi_reduction <maximumf>, %15, %cst_6 [1] : vector<32x128xf32> to vector<32xf32>
    %17 = vector.shape_cast %16 : vector<32xf32> to vector<32x1xf32>
    %18 = vector.broadcast %17 : vector<32x1xf32> to vector<32x128xf32>
    %19 = arith.subf %15, %18 : vector<32x128xf32>
    %20 = math.exp %19 : vector<32x128xf32>
    %cst_7 = arith.constant dense<0.000000e+00> : vector<32xf32>
    %21 = vector.multi_reduction <add>, %20, %cst_7 [1] : vector<32x128xf32> to vector<32xf32>
    %22 = vector.shape_cast %21 : vector<32xf32> to vector<32x1xf32>
    %23 = tpu.reciprocal %22 {approx = true} : vector<32x1xf32> -> vector<32x1xf32>
    %24 = vector.broadcast %23 : vector<32x1xf32> to vector<32x128xf32>
    %25 = arith.mulf %20, %24 : vector<32x128xf32>
    %26 = arith.truncf %25 : vector<32x128xf32> to vector<32x128xbf16>
    %27 = arith.mulf %10, %26 : vector<32x128xbf16>
    %c1 = arith.constant 1 : index
    %c0_8 = arith.constant 0 : index
    %c0_9 = arith.constant 0 : index
    %28 = vector.load %arg5[%c1, %c0_8, %c0_9] : memref<9x128x128xbf16, #tpu.memory_space<vmem>>, vector<1x128x128xbf16>
    %29 = vector.shape_cast %28 : vector<1x128x128xbf16> to vector<128x128xbf16>
    %cst_10 = arith.constant dense<0.000000e+00> : vector<32x128xf32>
    %30 = tpu.matmul %27, %29, %cst_10 {dimension_numbers = #tpu.dot_dimension_numbers<[1], [0], [0], [1], [0, 0, 1, 1], [], []>} : vector<32x128xbf16>, vector<128x128xbf16>, vector<32x128xf32> -> vector<32x128xf32>
    %31 = vector.broadcast %3 : vector<1x128xf32> to vector<32x128xf32>
    %32 = arith.addf %30, %31 : vector<32x128xf32>
    %33 = arith.negf %32 : vector<32x128xf32>
    %34 = math.exp %33 : vector<32x128xf32>
    %cst_11 = arith.constant 1.000000e+00 : f32
    %35 = vector.broadcast %cst_11 : f32 to vector<32x128xf32>
    %36 = arith.addf %35, %34 : vector<32x128xf32>
    %37 = arith.divf %35, %36 : vector<32x128xf32>
    %c0_12 = arith.constant 0 : index
    %c0_13 = arith.constant 0 : index
    %38 = vector.load %arg0[%c0_12, %c0_13] : memref<32x128xf32, #tpu.memory_space<vmem>>, vector<32x128xf32>
    %39 = vector.broadcast %2 : vector<1x128xf32> to vector<32x128xf32>
    %40 = arith.mulf %37, %39 : vector<32x128xf32>
    %41 = arith.addf %38, %40 : vector<32x128xf32>
    %c0_14 = arith.constant 0 : index
    %c0_15 = arith.constant 0 : index
    %c0_16 = arith.constant 0 : index
    %42 = vector.load %arg6[%c0_14, %c0_15, %c0_16] : memref<2x128x512xbf16, #tpu.memory_space<vmem>>, vector<1x128x512xbf16>
    %43 = vector.shape_cast %42 : vector<1x128x512xbf16> to vector<128x512xbf16>
    %c2 = arith.constant 2 : index
    %c0_17 = arith.constant 0 : index
    %c0_18 = arith.constant 0 : index
    %44 = vector.load %arg5[%c2, %c0_17, %c0_18] : memref<9x128x128xbf16, #tpu.memory_space<vmem>>, vector<1x128x128xbf16>
    %45 = vector.shape_cast %44 : vector<1x128x128xbf16> to vector<128x128xbf16>
    %46 = arith.truncf %41 : vector<32x128xf32> to vector<32x128xbf16>
    %cst_19 = arith.constant dense<0.000000e+00> : vector<32x512xf32>
    %47 = tpu.matmul %46, %43, %cst_19 {dimension_numbers = #tpu.dot_dimension_numbers<[1], [0], [0], [1], [0, 0, 1, 1], [], []>} : vector<32x128xbf16>, vector<128x512xbf16>, vector<32x512xf32> -> vector<32x512xf32>
    %48 = arith.truncf %47 : vector<32x512xf32> to vector<32x512xbf16>
    %49 = vector.extract_strided_slice %48 {offsets = [0, 0], sizes = [32, 128], strides = [1, 1]} : vector<32x512xbf16> to vector<32x128xbf16>
    %c0_20 = arith.constant 0 : index
    %c0_21 = arith.constant 0 : index
    %50 = vector.load %arg8[%c0_20, %c0_21] : memref<128x128xbf16, #tpu.memory_space<vmem>>, vector<32x128xbf16>
    tpu.vector_store %arg8[%c0_20, %c0_21], %49 {strides = array<i32>} : memref<128x128xbf16, #tpu.memory_space<vmem>>, vector<32x128xbf16>,
    %51 = vector.extract_strided_slice %48 {offsets = [0, 128], sizes = [32, 128], strides = [1, 1]} : vector<32x512xbf16> to vector<32x128xbf16>
    %c32 = arith.constant 32 : index
    %c0_22 = arith.constant 0 : index
    %52 = vector.load %arg8[%c32, %c0_22] : memref<128x128xbf16, #tpu.memory_space<vmem>>, vector<32x128xbf16>
    tpu.vector_store %arg8[%c32, %c0_22], %51 {strides = array<i32>} : memref<128x128xbf16, #tpu.memory_space<vmem>>, vector<32x128xbf16>,
    %53 = vector.extract_strided_slice %48 {offsets = [0, 256], sizes = [32, 128], strides = [1, 1]} : vector<32x512xbf16> to vector<32x128xbf16>
    %c64 = arith.constant 64 : index
    %c0_23 = arith.constant 0 : index
    %54 = vector.load %arg8[%c64, %c0_23] : memref<128x128xbf16, #tpu.memory_space<vmem>>, vector<32x128xbf16>
    tpu.vector_store %arg8[%c64, %c0_23], %53 {strides = array<i32>} : memref<128x128xbf16, #tpu.memory_space<vmem>>, vector<32x128xbf16>,
    %55 = vector.extract_strided_slice %48 {offsets = [0, 384], sizes = [32, 128], strides = [1, 1]} : vector<32x512xbf16> to vector<32x128xbf16>
    %c96 = arith.constant 96 : index
    %c0_24 = arith.constant 0 : index
    %56 = vector.load %arg8[%c96, %c0_24] : memref<128x128xbf16, #tpu.memory_space<vmem>>, vector<32x128xbf16>
    tpu.vector_store %arg8[%c96, %c0_24], %55 {strides = array<i32>} : memref<128x128xbf16, #tpu.memory_space<vmem>>, vector<32x128xbf16>,
    %c0_25 = arith.constant 0 : index
    %c0_26 = arith.constant 0 : index
    %57 = vector.load %arg2[%c0_25, %c0_26] : memref<32x128xbf16, #tpu.memory_space<vmem>>, vector<32x128xbf16>
    %c0_27 = arith.constant 0 : index
    %c0_28 = arith.constant 0 : index
    %58 = vector.load %arg8[%c0_27, %c0_28] : memref<128x128xbf16, #tpu.memory_space<vmem>>, vector<128x128xbf16>
    %cst_29 = arith.constant dense<0.000000e+00> : vector<32x128xf32>
    %59 = tpu.matmul %57, %58, %cst_29 {dimension_numbers = #tpu.dot_dimension_numbers<[1], [0], [0], [1], [0, 0, 1, 1], [], []>} : vector<32x128xbf16>, vector<128x128xbf16>, vector<32x128xf32> -> vector<32x128xf32>
    %cst_30 = arith.constant dense<0.000000e+00> : vector<32x128xf32>
    %60 = tpu.matmul %46, %45, %cst_30 {dimension_numbers = #tpu.dot_dimension_numbers<[1], [0], [0], [1], [0, 0, 1, 1], [], []>} : vector<32x128xbf16>, vector<128x128xbf16>, vector<32x128xf32> -> vector<32x128xf32>
    %61 = arith.addf %59, %60 : vector<32x128xf32>
    %62 = vector.broadcast %4 : vector<1x128xf32> to vector<32x128xf32>
    %63 = arith.addf %61, %62 : vector<32x128xf32>
    %cst_31 = arith.constant 0.000000e+00 : f32
    %64 = vector.broadcast %cst_31 : f32 to vector<32x128xf32>
    %65 = arith.maximumf %63, %64 : vector<32x128xf32>
    %c1_32 = arith.constant 1 : index
    %c0_33 = arith.constant 0 : index
    %c0_34 = arith.constant 0 : index
    %66 = vector.load %arg6[%c1_32, %c0_33, %c0_34] : memref<2x128x512xbf16, #tpu.memory_space<vmem>>, vector<1x128x512xbf16>
    %67 = vector.shape_cast %66 : vector<1x128x512xbf16> to vector<128x512xbf16>
    %c3 = arith.constant 3 : index
    %c0_35 = arith.constant 0 : index
    %c0_36 = arith.constant 0 : index
    %68 = vector.load %arg5[%c3, %c0_35, %c0_36] : memref<9x128x128xbf16, #tpu.memory_space<vmem>>, vector<1x128x128xbf16>
    %69 = vector.shape_cast %68 : vector<1x128x128xbf16> to vector<128x128xbf16>
    %70 = arith.truncf %65 : vector<32x128xf32> to vector<32x128xbf16>
    %cst_37 = arith.constant dense<0.000000e+00> : vector<32x512xf32>
    %71 = tpu.matmul %70, %67, %cst_37 {dimension_numbers = #tpu.dot_dimension_numbers<[1], [0], [0], [1], [0, 0, 1, 1], [], []>} : vector<32x128xbf16>, vector<128x512xbf16>, vector<32x512xf32> -> vector<32x512xf32>
    %72 = arith.truncf %71 : vector<32x512xf32> to vector<32x512xbf16>
    %73 = vector.extract_strided_slice %72 {offsets = [0, 0], sizes = [32, 128], strides = [1, 1]} : vector<32x512xbf16> to vector<32x128xbf16>
    %c0_38 = arith.constant 0 : index
    %c0_39 = arith.constant 0 : index
    %74 = vector.load %arg8[%c0_38, %c0_39] : memref<128x128xbf16, #tpu.memory_space<vmem>>, vector<32x128xbf16>
    tpu.vector_store %arg8[%c0_38, %c0_39], %73 {strides = array<i32>} : memref<128x128xbf16, #tpu.memory_space<vmem>>, vector<32x128xbf16>,
    %75 = vector.extract_strided_slice %72 {offsets = [0, 128], sizes = [32, 128], strides = [1, 1]} : vector<32x512xbf16> to vector<32x128xbf16>
    %c32_40 = arith.constant 32 : index
    %c0_41 = arith.constant 0 : index
    %76 = vector.load %arg8[%c32_40, %c0_41] : memref<128x128xbf16, #tpu.memory_space<vmem>>, vector<32x128xbf16>
    tpu.vector_store %arg8[%c32_40, %c0_41], %75 {strides = array<i32>} : memref<128x128xbf16, #tpu.memory_space<vmem>>, vector<32x128xbf16>,
    %77 = vector.extract_strided_slice %72 {offsets = [0, 256], sizes = [32, 128], strides = [1, 1]} : vector<32x512xbf16> to vector<32x128xbf16>
    %c64_42 = arith.constant 64 : index
    %c0_43 = arith.constant 0 : index
    %78 = vector.load %arg8[%c64_42, %c0_43] : memref<128x128xbf16, #tpu.memory_space<vmem>>, vector<32x128xbf16>
    tpu.vector_store %arg8[%c64_42, %c0_43], %77 {strides = array<i32>} : memref<128x128xbf16, #tpu.memory_space<vmem>>, vector<32x128xbf16>,
    %79 = vector.extract_strided_slice %72 {offsets = [0, 384], sizes = [32, 128], strides = [1, 1]} : vector<32x512xbf16> to vector<32x128xbf16>
    %c96_44 = arith.constant 96 : index
    %c0_45 = arith.constant 0 : index
    %80 = vector.load %arg8[%c96_44, %c0_45] : memref<128x128xbf16, #tpu.memory_space<vmem>>, vector<32x128xbf16>
    tpu.vector_store %arg8[%c96_44, %c0_45], %79 {strides = array<i32>} : memref<128x128xbf16, #tpu.memory_space<vmem>>, vector<32x128xbf16>,
    %c0_46 = arith.constant 0 : index
    %c0_47 = arith.constant 0 : index
    %81 = vector.load %arg2[%c0_46, %c0_47] : memref<32x128xbf16, #tpu.memory_space<vmem>>, vector<32x128xbf16>
    %c0_48 = arith.constant 0 : index
    %c0_49 = arith.constant 0 : index
    %82 = vector.load %arg8[%c0_48, %c0_49] : memref<128x128xbf16, #tpu.memory_space<vmem>>, vector<128x128xbf16>
    %cst_50 = arith.constant dense<0.000000e+00> : vector<32x128xf32>
    %83 = tpu.matmul %81, %82, %cst_50 {dimension_numbers = #tpu.dot_dimension_numbers<[1], [0], [0], [1], [0, 0, 1, 1], [], []>} : vector<32x128xbf16>, vector<128x128xbf16>, vector<32x128xf32> -> vector<32x128xf32>
    %cst_51 = arith.constant dense<0.000000e+00> : vector<32x128xf32>
    %84 = tpu.matmul %70, %69, %cst_51 {dimension_numbers = #tpu.dot_dimension_numbers<[1], [0], [0], [1], [0, 0, 1, 1], [], []>} : vector<32x128xbf16>, vector<128x128xbf16>, vector<32x128xf32> -> vector<32x128xf32>
    %85 = arith.addf %83, %84 : vector<32x128xf32>
    %86 = vector.broadcast %5 : vector<1x128xf32> to vector<32x128xf32>
    %87 = arith.addf %85, %86 : vector<32x128xf32>
    %cst_52 = arith.constant 0.000000e+00 : f32
    %88 = vector.broadcast %cst_52 : f32 to vector<32x128xf32>
    %89 = arith.maximumf %87, %88 : vector<32x128xf32>
    %c4 = arith.constant 4 : index
    %c0_53 = arith.constant 0 : index
    %c0_54 = arith.constant 0 : index
    %90 = vector.load %arg5[%c4, %c0_53, %c0_54] : memref<9x128x128xbf16, #tpu.memory_space<vmem>>, vector<1x128x128xbf16>
    %91 = vector.shape_cast %90 : vector<1x128x128xbf16> to vector<128x128xbf16>
    %cst_55 = arith.constant dense<0.000000e+00> : vector<8x128xf32>
    %92 = tpu.matmul %9, %91, %cst_55 {dimension_numbers = #tpu.dot_dimension_numbers<[1], [0], [0], [1], [0, 0, 1, 1], [], []>} : vector<8x128xbf16>, vector<128x128xbf16>, vector<8x128xf32> -> vector<8x128xf32>
    %93 = arith.truncf %92 : vector<8x128xf32> to vector<8x128xbf16>
    %c5 = arith.constant 5 : index
    %c0_56 = arith.constant 0 : index
    %c0_57 = arith.constant 0 : index
    %94 = vector.load %arg5[%c5, %c0_56, %c0_57] : memref<9x128x128xbf16, #tpu.memory_space<vmem>>, vector<1x128x128xbf16>
    %95 = vector.shape_cast %94 : vector<1x128x128xbf16> to vector<128x128xbf16>
    %cst_58 = arith.constant dense<0.000000e+00> : vector<8x128xf32>
    %96 = tpu.matmul %93, %95, %cst_58 {dimension_numbers = #tpu.dot_dimension_numbers<[1], [0], [0], [1], [0, 0, 1, 1], [], []>} : vector<8x128xbf16>, vector<128x128xbf16>, vector<8x128xf32> -> vector<8x128xf32>
    %97 = math.tanh %96 : vector<8x128xf32>
    %98 = arith.truncf %97 : vector<8x128xf32> to vector<8x128xbf16>
    %c6 = arith.constant 6 : index
    %c0_59 = arith.constant 0 : index
    %c0_60 = arith.constant 0 : index
    %99 = vector.load %arg5[%c6, %c0_59, %c0_60] : memref<9x128x128xbf16, #tpu.memory_space<vmem>>, vector<1x128x128xbf16>
    %100 = vector.shape_cast %99 : vector<1x128x128xbf16> to vector<128x128xbf16>
    %cst_61 = arith.constant dense<0.000000e+00> : vector<8x128xf32>
    %101 = tpu.matmul %98, %100, %cst_61 {dimension_numbers = #tpu.dot_dimension_numbers<[1], [0], [0], [1], [0, 0, 1, 1], [], []>} : vector<8x128xbf16>, vector<128x128xbf16>, vector<8x128xf32> -> vector<8x128xf32>
    %102 = math.tanh %101 : vector<8x128xf32>
    %103 = vector.broadcast %7 : vector<1x128xf32> to vector<8x128xf32>
    %104 = arith.mulf %102, %103 : vector<8x128xf32>
    %cst_62 = arith.constant dense<0.000000e+00> : vector<8xf32>
    %105 = vector.multi_reduction <add>, %104, %cst_62 [1] : vector<8x128xf32> to vector<8xf32>
    %106 = vector.shape_cast %105 : vector<8xf32> to vector<8x1xf32>
    %c0_63 = arith.constant 0 : index
    %c0_64 = arith.constant 0 : index
    %107 = vector.load %arg3[%c0_63, %c0_64] : memref<24x32xbf16, #tpu.memory_space<vmem>>, vector<24x32xbf16>
    %108 = arith.truncf %65 : vector<32x128xf32> to vector<32x128xbf16>
    %cst_65 = arith.constant dense<0.000000e+00> : vector<24x128xf32>
    %109 = tpu.matmul %107, %108, %cst_65 {dimension_numbers = #tpu.dot_dimension_numbers<[1], [0], [0], [1], [0, 0, 1, 1], [], []>} : vector<24x32xbf16>, vector<32x128xbf16>, vector<24x128xf32> -> vector<24x128xf32>
    %110 = arith.truncf %89 : vector<32x128xf32> to vector<32x128xbf16>
    %cst_66 = arith.constant dense<0.000000e+00> : vector<24x128xf32>
    %111 = tpu.matmul %107, %110, %cst_66 {dimension_numbers = #tpu.dot_dimension_numbers<[1], [0], [0], [1], [0, 0, 1, 1], [], []>} : vector<24x32xbf16>, vector<32x128xbf16>, vector<24x128xf32> -> vector<24x128xf32>
    %112 = arith.truncf %109 : vector<24x128xf32> to vector<24x128xbf16>
    %c7 = arith.constant 7 : index
    %c0_67 = arith.constant 0 : index
    %c0_68 = arith.constant 0 : index
    %113 = vector.load %arg5[%c7, %c0_67, %c0_68] : memref<9x128x128xbf16, #tpu.memory_space<vmem>>, vector<1x128x128xbf16>
    %114 = vector.shape_cast %113 : vector<1x128x128xbf16> to vector<128x128xbf16>
    %cst_69 = arith.constant dense<0.000000e+00> : vector<24x128xf32>
    %115 = tpu.matmul %112, %114, %cst_69 {dimension_numbers = #tpu.dot_dimension_numbers<[1], [0], [0], [1], [0, 0, 1, 1], [], []>} : vector<24x128xbf16>, vector<128x128xbf16>, vector<24x128xf32> -> vector<24x128xf32>
    %116 = arith.truncf %111 : vector<24x128xf32> to vector<24x128xbf16>
    %c8 = arith.constant 8 : index
    %c0_70 = arith.constant 0 : index
    %c0_71 = arith.constant 0 : index
    %117 = vector.load %arg5[%c8, %c0_70, %c0_71] : memref<9x128x128xbf16, #tpu.memory_space<vmem>>, vector<1x128x128xbf16>
    %118 = vector.shape_cast %117 : vector<1x128x128xbf16> to vector<128x128xbf16>
    %cst_72 = arith.constant dense<0.000000e+00> : vector<24x128xf32>
    %119 = tpu.matmul %116, %118, %cst_72 {dimension_numbers = #tpu.dot_dimension_numbers<[1], [0], [0], [1], [0, 0, 1, 1], [], []>} : vector<24x128xbf16>, vector<128x128xbf16>, vector<24x128xf32> -> vector<24x128xf32>
    %120 = arith.addf %115, %119 : vector<24x128xf32>
    %121 = vector.extract_strided_slice %120 {offsets = [0, 0], sizes = [8, 1], strides = [1, 1]} : vector<24x128xf32> to vector<8x1xf32>
    %122 = vector.extract_strided_slice %120 {offsets = [8, 1], sizes = [8, 1], strides = [1, 1]} : vector<24x128xf32> to vector<8x1xf32>
    %123 = arith.addf %121, %122 : vector<8x1xf32>
    %124 = vector.extract_strided_slice %120 {offsets = [16, 2], sizes = [8, 1], strides = [1, 1]} : vector<24x128xf32> to vector<8x1xf32>
    %125 = arith.addf %123, %124 : vector<8x1xf32>
    %126 = arith.addf %125, %106 : vector<8x1xf32>
    %127 = vector.broadcast %126 : vector<8x1xf32> to vector<8x128xf32>
    %128 = vector.broadcast %6 : vector<1x128xf32> to vector<8x128xf32>
    %129 = arith.addf %127, %128 : vector<8x128xf32>
    %c0_73 = arith.constant 0 : index
    %c0_74 = arith.constant 0 : index
    %130 = vector.load %arg7[%c0_73, %c0_74] : memref<8x128xf32, #tpu.memory_space<vmem>>, vector<8x128xf32>
    tpu.vector_store %arg7[%c0_73, %c0_74], %129 {strides = array<i32>} : memref<8x128xf32, #tpu.memory_space<vmem>>, vector<8x128xf32>,
    return
  }
}

</mosaic_0001>

<bundles_post_ra>
// kernel: graph_classifier_forward.1
= control target key start
LH: loop header
LB: loop body
LE: loop exit
PB: predicated region body
PF: predicated region fallthrough
CT: control target
= control target key end

     0   :  { %12 = vsyncpa [#allocation4], 0  ;;  %s3449_s24 = smov [#allocation3]   ;;  %s3876_s0 = inlined_call_operand.vmem [shape: f32[32,128], index: 0, kind: input, shape index: {}]   ;;  %s3877_s1 = inlined_call_operand.vmem [shape: bf16[32,128], index: 1, kind: input, shape index: {}]   ;;  %s3878_s2 = inlined_call_operand.vmem [shape: bf16[32,128], index: 2, kind: input, shape index: {}]   ;;  %s3879_s3 = inlined_call_operand.vmem [shape: bf16[24,32], index: 3, kind: input, shape index: {}]   ;;  %s3880_s4 = inlined_call_operand.vmem [shape: f32[16,128], index: 4, kind: input, shape index: {}]   ;;  %s3881_s5 = inlined_call_operand.vmem [shape: bf16[9,128,128], index: 5, kind: input, shape index: {}]   ;;  %s3882_s6 = inlined_call_operand.hbm [shape: bf16[2,128,512], index: 6, kind: input, shape index: {}]   ;;  %s3883_s7 = inlined_call_operand.vmem [shape: f32[8,128], index: 7, kind: output, shape index: {}]  }
   0x1   :  { %s30_s25 = sshll.u32 %s3449_s24, 4  ;;  %s31_s25 = int_to_ptr.vmem [resolvable:$true] %s30_s25 }
   0x2   :  { %s3435_s26 = scalar_lea.vmem %s31_s25, 8192  ;;  %p3440_p1 = scmp.lt.s32.totalorder %s31_s25, %s31_s25 }
   0x3   :  { %p3436_p0 = scmp.ne.s32.totalorder %s31_s25, %s3435_s26  ;;  %p3441_p2 = scmp.lt.s32.totalorder %s3435_s26, %s3435_s26 }
   0x5   :  { %p3442_p3 = por %p3441_p2, %p3440_p1 }
   0x7   :  { %p3443_p4 = pnand %p3442_p3, %p3436_p0 }
   0x9   :  { %3446 = shalt.err (!%p3443_p4)
}
   0xa   :  { %s3450_s27 = smov 256   ;;  %s3451_s28 = smov 16  }
   0xb   :  { %36 = dma.hbm_to_vmem [thread:$0]  %s3882_s6, 8192, %s31_s25, [#allocation4], %s3450_s27, %s3450_s27, %s3451_s28  }
   0xc   :  { %3447 = dma.done.wait [#allocation4], 8192  }
   0xd   :  { %3448 = vsyncadd [#allocation4], 4294959104  ;;  %v3198_v0 = vld [vmem:[%s3881_s5 + $0x38] sm:$0xff]   ;;  %v3199_v1 = vld [vmem:[%s3881_s5 + $0x30] sm:$0xff]   ;;  %v64_v14 = vlaneseq  ;;  %vm3454_vm0 = vmmov 0   ;;  %vm2011_vm1 = vcmask 261120  }
   0xe   :  { %2952 = vmatprep.subr.bf16.mxu0 %v3198_v0  ;;  %v3200_v2 = vld [vmem:[%s3881_s5 + $0x28] sm:$0xff]   ;;  %v3201_v3 = vld [vmem:[%s3881_s5 + $0x20] sm:$0xff]   ;;  %v3202_v7 = vld [vmem:[%s3881_s5 + $0x18] sm:$0xff]   ;;  %s3456_s23 = smov 127  }
   0xf   :  { %2953 = vmatpush3.bf16.msra.mxu0 %v3198_v0  ;;  %v3515_v4 = vld [vmem:[%s3877_s1] sm:$0xf]  ;;  %v3520_v5 = vld [vmem:[%s3877_s1 + $0x4] sm:$0xf]  ;;  %v3203_v8 = vld [vmem:[%s3881_s5 + $0x10] sm:$0xff]   ;;  %v3548_v15 = vshrl.u32 %v64_v14, 7 }
  0x10   :  { %2954 = vmatprep.subr.bf16.mxu0 %v3199_v1  ;;  %v2373_v6 = vcombine.low %v3515_v4, %v3520_v5  ;;  %v3204_v9 = vld [vmem:[%s3881_s5 + $0x8] sm:$0xff]   ;;  %v3205_v10 = vld [vmem:[%s3881_s5] sm:$0xff]   ;;  %v3208_v27 = vld [vmem:[%s3881_s5 + $0x78] sm:$0xff]  }
  0x11   :  { %v3539_v11 = vld [vmem:[%s3877_s1 + $0x8] sm:$0xf]  ;;  %v3544_v12 = vld [vmem:[%s3877_s1 + $0xc] sm:$0xf]  ;;  %v66_v16 = vsub.s32 0, %v3548_v15  ;;  %v3554_v17 = vld [vmem:[%s3880_s4] sm:$0xff]  ;;  %2972 = vmatprep.subr.bf16.mxu1 %v3208_v27 }
  0x12   :  { %2968 = vmatprep.mubr.bf16.mxu0 %v2373_v6  ;;  %v2374_v13 = vcombine.low %v3539_v11, %v3544_v12  ;;  %2973 = vmatpush3.bf16.msra.mxu1 %v3208_v27  ;;  %v3209_v44 = vld [vmem:[%s3881_s5 + $0x70] sm:$0xff]   ;;  %v3210_v45 = vld [vmem:[%s3881_s5 + $0x68] sm:$0xff]   ;;  %v3211_v46 = vld [vmem:[%s3881_s5 + $0x60] sm:$0xff]  }
  0x13   :  { %2955 = vmatpush3.bf16.msra.mxu0 %v3199_v1  ;;  %v67_v18 = vrot.slane %v3554_v17, %v66_v16  ;;  %2974 = vmatprep.subr.bf16.mxu1 %v3209_v44  ;;  %v3212_v47 = vld [vmem:[%s3881_s5 + $0x58] sm:$0xff]   ;;  %v3213_v48 = vld [vmem:[%s3881_s5 + $0x50] sm:$0xff]   ;;  %v3214_v49 = vld [vmem:[%s3881_s5 + $0x48] sm:$0xff]  }
  0x14   :  { %2956 = vmatprep.subr.bf16.mxu0 %v3200_v2  ;;  %v3215_v50 = vld [vmem:[%s3881_s5 + $0x40] sm:$0xff]   ;;  %v3221_v16 = vld [vmem:[#allocation3 + $0xec] ss:$16 sps:$4 sm:$0xff]  }
  0x15   :  { %v3216_v14 = vld [vmem:[#allocation3 + $0xe0] ss:$16 sps:$4 sm:$0xff]   ;;  %v3242_v27 = vld [vmem:[#allocation3 + $0x64] ss:$16 sps:$4 sm:$0xff]  }
  0x16   :  { %2975 = vmatpush3.bf16.msra.mxu1 %v3209_v44  ;;  %v3264_v44 = vld [vmem:[%s3881_s5 + $0xb8] sm:$0xff]  }
  0x17   :  { %2957 = vmatpush3.bf16.msra.mxu0 %v3200_v2  ;;  %2976 = vmatprep.subr.bf16.mxu1 %v3210_v45 }
  0x18   :  { %2958 = vmatprep.subr.bf16.mxu0 %v3201_v3 }
  0x1a   :  { %2977 = vmatpush3.bf16.msra.mxu1 %v3210_v45  ;;  %v252_v45 = vsub.s32 2, %v3548_v15 }
  0x1b   :  { %2959 = vmatpush3.bf16.msra.mxu0 %v3201_v3  ;;  %2978 = vmatprep.subr.bf16.mxu1 %v3211_v46 }
  0x1c   :  { %2960 = vmatprep.subr.bf16.mxu0 %v3202_v7 }
  0x1e   :  { %2979 = vmatpush3.bf16.msra.mxu1 %v3211_v46  ;;  %v253_v46 = vrot.slane %v3554_v17, %v252_v45 }
  0x1f   :  { %2961 = vmatpush3.bf16.msra.mxu0 %v3202_v7  ;;  %2980 = vmatprep.subr.bf16.mxu1 %v3212_v47 }
  0x20   :  { %2962 = vmatprep.subr.bf16.mxu0 %v3203_v8 }
  0x22   :  { %2981 = vmatpush3.bf16.msra.mxu1 %v3212_v47 }
  0x23   :  { %2963 = vmatpush3.bf16.msra.mxu0 %v3203_v8  ;;  %2982 = vmatprep.subr.bf16.mxu1 %v3213_v48 }
  0x24   :  { %2964 = vmatprep.subr.bf16.mxu0 %v3204_v9 }
  0x26   :  { %2983 = vmatpush3.bf16.msra.mxu1 %v3213_v48 }
  0x27   :  { %2965 = vmatpush3.bf16.msra.mxu0 %v3204_v9  ;;  %2984 = vmatprep.subr.bf16.mxu1 %v3214_v49 }
  0x28   :  { %2966 = vmatprep.subr.bf16.mxu0 %v3205_v10 }
  0x2a   :  { %2985 = vmatpush3.bf16.msra.mxu1 %v3214_v49 }
  0x2b   :  { %2967 = vmatpush3.bf16.msra.mxu0 %v3205_v10  ;;  %2986 = vmatprep.subr.bf16.mxu1 %v3215_v50 }
  0x2e   :  { %2969 = vmatmul.mubr.bf16.vlgmr.msra.gmra.mxu0 %v2374_v13  ;;  %2987 = vmatpush3.bf16.msra.mxu1 %v3215_v50  ;;  %v3218_v13 = vld [vmem:[#allocation3 + $0xe4] ss:$16 sps:$4 sm:$0xff]  }
  0x2f   :  { %614 = vmatprep.subr.bf16.mxu0 %v3218_v13  ;;  %667 = vmatprep.subr.bf16.mxu1 %v3221_v16  ;;  %v388_v13 = vld [vmem:[%s3876_s0 + $0x8] sm:$0xff] }
  0x30   :  { %615 = vmatpush1.bf16.msra.mxu0 %v3216_v14 }
  0xee   :  { %v2970_v19 = vpop.f32.mrf.mxu0 }
  0xef   :  { %v171_v20 = vadd.f32 %v2970_v19, %v67_v18  ;;  %v3227_v19 = vld [vmem:[#allocation3 + $0xcc] ss:$16 sps:$4 sm:$0xff]  }
  0xf0   :  { %v162_v21 = vpop.f32.mrf.mxu0 }
  0xf1   :  { %v163_v22 = vadd.f32 %v162_v21, %v67_v18  ;;  %181 = vmax.xlane.f32.xlu1 %v171_v20  ;;  %v3233_v21 = vld [vmem:[#allocation3 + $0xac] ss:$16 sps:$4 sm:$0xff]  }
  0xf2   :  { %v2971_v23 = vpop.f32.mrf.mxu0 }
  0xf3   :  { %v174_v24 = vadd.f32 %v2971_v23, %v67_v18  ;;  %177 = vmax.xlane.f32.xlu0 %v163_v22  ;;  %v3236_v23 = vld [vmem:[#allocation3 + $0x84] ss:$16 sps:$4 sm:$0xff]  }
  0xf4   :  { %v165_v25 = vpop.f32.mrf.mxu0 }
  0xf5   :  { %v166_v26 = vadd.f32 %v165_v25, %v67_v18  ;;  %183 = vmax.xlane.f32.xlu1 %v174_v24  ;;  %v3219_v18 = vld [vmem:[#allocation3 + $0xe8] ss:$16 sps:$4 sm:$0xff]   ;;  %v3239_v25 = vld [vmem:[#allocation3 + $0x8c] ss:$16 sps:$4 sm:$0xff]  }
  0xf7   :  { %179 = vmax.xlane.f32.xlu0 %v166_v26 }
 0x17a   :  { %v182_v28 = vpop.xlane.xlu1 %181 }
 0x17b   :  { %v187_v29 = vsub.f32 %v171_v20, %v182_v28  ;;  %v3225_v20 = vld [vmem:[#allocation3 + $0xc8] ss:$16 sps:$4 sm:$0xff]   ;;  %v3240_v28 = vld [vmem:[#allocation3 + $0x60] ss:$16 sps:$4 sm:$0xff]  }
 0x17c   :  { %v178_v30 = vpop.xlane.xlu0 %177 }
 0x17d   :  { %v185_v31 = vsub.f32 %v163_v22, %v178_v30  ;;  %v193_v34 = vmul.f32 1.442695, %v187_v29  ;;  %v3231_v22 = vld [vmem:[#allocation3 + $0xa8] ss:$16 sps:$4 sm:$0xff]   ;;  %v3245_v29 = vld [vmem:[#allocation3 + $0x6c] ss:$16 sps:$4 sm:$0xff]  }
 0x17e   :  { %v184_v32 = vpop.xlane.xlu1 %183  ;;  %v3243_v30 = vld [vmem:[#allocation3 + $0x68] ss:$16 sps:$4 sm:$0xff]  }
 0x17f   :  { %v189_v33 = vmul.f32 1.442695, %v185_v31  ;;  %v188_v36 = vsub.f32 %v174_v24, %v184_v32  ;;  %v3234_v24 = vld [vmem:[#allocation3 + $0x80] ss:$16 sps:$4 sm:$0xff]   ;;  %v3248_v31 = vld [vmem:[#allocation3 + $0x44] ss:$16 sps:$4 sm:$0xff]  }
 0x180   :  { %v180_v35 = vpop.xlane.xlu0 %179  ;;  %v3251_v32 = vld [vmem:[#allocation3 + $0x4c] ss:$16 sps:$4 sm:$0xff]  }
 0x181   :  { %3390 = vpow2.f32 %v189_v33  ;;  %v186_v37 = vsub.f32 %v166_v26, %v180_v35  ;;  %v195_v39 = vmul.f32 1.442695, %v188_v36  ;;  %v3237_v26 = vld [vmem:[#allocation3 + $0x88] ss:$16 sps:$4 sm:$0xff]   ;;  %v3246_v33 = vld [vmem:[#allocation3 + $0x40] ss:$16 sps:$4 sm:$0xff]  }
 0x182   :  { %3392 = vpow2.f32 %v193_v34  ;;  %v3249_v34 = vld [vmem:[#allocation3 + $0x48] ss:$16 sps:$4 sm:$0xff]   ;;  %v3254_v35 = vld [vmem:[#allocation3 + $0x24] ss:$16 sps:$4 sm:$0xff]   ;;  %v3257_v36 = vld [vmem:[#allocation3 + $0x2c] ss:$16 sps:$4 sm:$0xff]  }
 0x183   :  { %v191_v38 = vmul.f32 1.442695, %v186_v37  ;;  %v3452_v37 = vmov 0  }
 0x184   :  { %646 = vmatprep.mubr.bf16.mxu0 %v3452_v37  ;;  %3196 = vset.pattern.permute.xlu1 %v3452_v37 }
 0x185   :  { %3394 = vpow2.f32 %v191_v38  ;;  %v3252_v38 = vld [vmem:[#allocation3 + $0x20] ss:$16 sps:$4 sm:$0xff]   ;;  %3197 = vset.pattern.permute.xlu0 %v3452_v37 }
 0x186   :  { %3396 = vpow2.f32 %v195_v39  ;;  %v3255_v39 = vld [vmem:[#allocation3 + $0x28] ss:$16 sps:$4 sm:$0xff]  }
 0x18e   :  { %v3391_v40 = vpop.eup %3390 }
 0x18f   :  { %197 = vadd.xlane.f32.xlu0 %v3391_v40  ;;  %v3393_v41 = vpop.eup %3392 }
 0x192   :  { %v3395_v42 = vpop.eup %3394 }
 0x193   :  { %201 = vadd.xlane.f32.xlu0 %v3393_v41  ;;  %199 = vadd.xlane.f32.xlu1 %v3395_v42  ;;  %v3397_v43 = vpop.eup %3396 }
 0x197   :  { %203 = vadd.xlane.f32.xlu1 %v3397_v43 }
 0x218   :  { %v198_v51 = vpop.xlane.xlu0 %197 }
 0x219   :  { %3398 = vrcp.f32 %v198_v51 }
 0x21c   :  { %v200_v52 = vpop.xlane.xlu1 %199  ;;  %v202_v53 = vpop.xlane.xlu0 %201 }
 0x21d   :  { %3400 = vrcp.f32 %v200_v52 }
 0x21e   :  { %3402 = vrcp.f32 %v202_v53 }
 0x220   :  { %v204_v54 = vpop.xlane.xlu1 %203 }
 0x221   :  { %3404 = vrcp.f32 %v204_v54 }
 0x226   :  { %v3399_v55 = vpop.eup %3398 }
 0x227   :  { %v209_v56 = vmul.f32 %v3399_v55, %v3391_v40  ;;  %v3260_v40 = vld [vmem:[#allocation3 + $0x4] ss:$16 sps:$4 sm:$0xff]  }
 0x229   :  { %v2707_v60 = vpack.c.bf16 %v209_v56, %v209_v56 }
 0x22a   :  { %v3401_v57 = vpop.eup %3400 }
 0x22b   :  { %v3403_v58 = vpop.eup %3402  ;;  %v210_v59 = vmul.f32 %v3401_v57, %v3395_v42  ;;  %v229_v0 = vmul.bf16 %v2707_v60, %v3515_v4  ;;  %v3224_v4 = vld [vmem:[#allocation3 + $0xc4] ss:$16 sps:$4 sm:$0xff]   ;;  %v3258_v42 = vld [vmem:[#allocation3] ss:$16 sps:$4 sm:$0xff]  }
 0x22c   :  { %v211_v61 = vmul.f32 %v3403_v58, %v3393_v41  ;;  %616 = vmatprep.subr.bf16.mxu0 %v3224_v4  ;;  %v3263_v41 = vld [vmem:[#allocation3 + $0xc] ss:$16 sps:$4 sm:$0xff]  }
 0x22d   :  { %v2708_v62 = vpack.c.bf16 %v210_v59, %v210_v59 }
 0x22e   :  { %v3405_v63 = vpop.eup %3404  ;;  %v2709_v3 = vpack.c.bf16 %v211_v61, %v211_v61 }
 0x22f   :  { %v230_v1 = vmul.bf16 %v2708_v62, %v3520_v5  ;;  %v212_v2 = vmul.f32 %v3405_v63, %v3397_v43  ;;  %v3222_v5 = vld [vmem:[#allocation3 + $0xc0] ss:$16 sps:$4 sm:$0xff]   ;;  %v3261_v43 = vld [vmem:[#allocation3 + $0x8] ss:$16 sps:$4 sm:$0xff]  }
 0x230   :  { %v231_v8 = vmul.bf16 %v2709_v3, %v3539_v11  ;;  %617 = vmatpush1.bf16.msra.mxu0 %v3222_v5  ;;  %v3230_v11 = vld [vmem:[#allocation3 + $0xa4] ss:$16 sps:$4 sm:$0xff]   ;;  %v393_v3 = vsub.s32 1, %v3548_v15 }
 0x231   :  { %v2403_v6 = vcombine.low %v229_v0, %v230_v1  ;;  %v2710_v7 = vpack.c.bf16 %v212_v2, %v212_v2  ;;  %618 = vmatprep.subr.bf16.mxu0 %v3230_v11 }
 0x233   :  { %2988 = vmatprep.mubr.bf16.mxu1 %v2403_v6  ;;  %v232_v9 = vmul.bf16 %v2710_v7, %v3544_v12  ;;  %v3228_v12 = vld [vmem:[#allocation3 + $0xa0] ss:$16 sps:$4 sm:$0xff]   ;;  %v394_v7 = vrot.slane %v3554_v17, %v393_v3 }
 0x234   :  { %619 = vmatpush1.bf16.msra.mxu0 %v3228_v12  ;;  %v390_v12 = vld [vmem:[%s3876_s0 + $0x18] sm:$0xff] }
 0x235   :  { %v2404_v10 = vcombine.low %v231_v8, %v232_v9  ;;  %620 = vmatprep.subr.bf16.mxu0 %v3236_v23  ;;  %v3266_v23 = vld [vmem:[%s3881_s5 + $0xa8] sm:$0xff]  }
 0x237   :  { %2989 = vmatmul.mubr.bf16.vlgmr.msra.gmra.mxu1 %v2404_v10  ;;  %v387_v10 = vld [vmem:[%s3876_s0] sm:$0xff] }
 0x238   :  { %668 = vmatpush1.bf16.msra.mxu1 %v3219_v18  ;;  %621 = vmatpush1.bf16.msra.mxu0 %v3234_v24 }
 0x239   :  { %669 = vmatprep.subr.bf16.mxu1 %v3227_v19  ;;  %622 = vmatprep.subr.bf16.mxu0 %v3242_v27  ;;  %v3267_v27 = vld [vmem:[%s3881_s5 + $0xa0] sm:$0xff]  }
 0x23a   :  { %699 = vmatprep.mubr.bf16.mxu1 %v3452_v37 }
 0x23c   :  { %670 = vmatpush1.bf16.msra.mxu1 %v3225_v20  ;;  %623 = vmatpush1.bf16.msra.mxu0 %v3240_v28  ;;  %v3265_v20 = vld [vmem:[%s3881_s5 + $0xb0] sm:$0xff]   ;;  %v3268_v28 = vld [vmem:[%s3881_s5 + $0x98] sm:$0xff]  }
 0x23d   :  { %671 = vmatprep.subr.bf16.mxu1 %v3233_v21  ;;  %624 = vmatprep.subr.bf16.mxu0 %v3248_v31  ;;  %v3271_v31 = vld [vmem:[%s3881_s5 + $0x80] sm:$0xff]  }
 0x240   :  { %672 = vmatpush1.bf16.msra.mxu1 %v3231_v22  ;;  %625 = vmatpush1.bf16.msra.mxu0 %v3246_v33  ;;  %v389_v22 = vld [vmem:[%s3876_s0 + $0x10] sm:$0xff] }
 0x241   :  { %673 = vmatprep.subr.bf16.mxu1 %v3239_v25  ;;  %626 = vmatprep.subr.bf16.mxu0 %v3254_v35  ;;  %v3282_v33 = vld [vmem:[#allocation3 + $0x1e0] ss:$16 sps:$4 sm:$0xff]   ;;  %v3290_v35 = vld [vmem:[#allocation3 + $0x1c4] ss:$16 sps:$4 sm:$0xff]  }
 0x244   :  { %674 = vmatpush1.bf16.msra.mxu1 %v3237_v26  ;;  %627 = vmatpush1.bf16.msra.mxu0 %v3252_v38  ;;  %v3296_v38 = vld [vmem:[#allocation3 + $0x1a4] ss:$16 sps:$4 sm:$0xff]  }
 0x245   :  { %675 = vmatprep.subr.bf16.mxu1 %v3245_v29  ;;  %628 = vmatprep.subr.bf16.mxu0 %v3260_v40  ;;  %v3269_v29 = vld [vmem:[%s3881_s5 + $0x90] sm:$0xff]  }
 0x246   :  { %v3302_v40 = vld [vmem:[#allocation3 + $0x184] ss:$16 sps:$4 sm:$0xff]  }
 0x248   :  { %676 = vmatpush1.bf16.msra.mxu1 %v3243_v30  ;;  %629 = vmatpush1.bf16.msra.mxu0 %v3258_v42  ;;  %v3270_v30 = vld [vmem:[%s3881_s5 + $0x88] sm:$0xff]   ;;  %v3308_v42 = vld [vmem:[#allocation3 + $0x164] ss:$16 sps:$4 sm:$0xff]  }
 0x249   :  { %677 = vmatprep.subr.bf16.mxu1 %v3251_v32  ;;  %2992 = vmatprep.subr.bf16.mxu0 %v3264_v44  ;;  %v3280_v32 = vld [vmem:[%s3878_s2] sm:$0xff]  }
 0x24c   :  { %678 = vmatpush1.bf16.msra.mxu1 %v3249_v34  ;;  %v3284_v34 = vld [vmem:[#allocation3 + $0x1e4] ss:$16 sps:$4 sm:$0xff]  }
 0x24d   :  { %679 = vmatprep.subr.bf16.mxu1 %v3257_v36  ;;  %v3288_v36 = vld [vmem:[#allocation3 + $0x1c0] ss:$16 sps:$4 sm:$0xff]  }
 0x250   :  { %680 = vmatpush1.bf16.msra.mxu1 %v3255_v39  ;;  %v3294_v39 = vld [vmem:[#allocation3 + $0x1a0] ss:$16 sps:$4 sm:$0xff]  }
 0x251   :  { %681 = vmatprep.subr.bf16.mxu1 %v3263_v41  ;;  %v3300_v41 = vld [vmem:[#allocation3 + $0x180] ss:$16 sps:$4 sm:$0xff]  }
 0x254   :  { %682 = vmatpush1.bf16.msra.mxu1 %v3261_v43  ;;  %v3306_v43 = vld [vmem:[#allocation3 + $0x160] ss:$16 sps:$4 sm:$0xff]  }
 0x2f7   :  { %v2990_v47 = vpop.f32.mrf.mxu1 }
 0x2f8   :  { %v357_v48 = vadd.f32 %v2990_v47, %v253_v46 }
 0x2f9   :  { %v348_v49 = vpop.f32.mrf.mxu1 }
 0x2fa   :  { %v349_v50 = vadd.f32 %v348_v49, %v253_v46  ;;  %v2415_v54 = vmul.f32 -1.442695, %v357_v48 }
 0x2fb   :  { %v2991_v51 = vpop.f32.mrf.mxu1 }
 0x2fc   :  { %v2413_v52 = vmul.f32 -1.442695, %v349_v50  ;;  %v360_v53 = vadd.f32 %v2991_v51, %v253_v46 }
 0x2fd   :  { %v351_v55 = vpop.f32.mrf.mxu1 }
 0x2fe   :  { %3406 = vpow2.f32 %v2413_v52  ;;  %v2416_v56 = vmul.f32 -1.442695, %v360_v53  ;;  %v352_v57 = vadd.f32 %v351_v55, %v253_v46 }
 0x300   :  { %3408 = vpow2.f32 %v2416_v56  ;;  %v2414_v58 = vmul.f32 -1.442695, %v352_v57 }
 0x301   :  { %3410 = vpow2.f32 %v2415_v54 }
 0x302   :  { %3412 = vpow2.f32 %v2414_v58 }
 0x30b   :  { %v3407_v59 = vpop.eup %3406 }
 0x30c   :  { %v375_v60 = vadd.f32 1.0, %v3407_v59 }
 0x30d   :  { %v3409_v61 = vpop.eup %3408 }
 0x30e   :  { %v3411_v62 = vpop.eup %3410  ;;  %3414 = vrcp.f32 %v375_v60  ;;  %v378_v0 = vadd.f32 1.0, %v3409_v61 }
 0x30f   :  { %v3413_v63 = vpop.eup %3412  ;;  %v377_v2 = vadd.f32 1.0, %v3411_v62 }
 0x310   :  { %v376_v1 = vadd.f32 1.0, %v3413_v63 }
 0x312   :  { %3416 = vrcp.f32 %v376_v1 }
 0x313   :  { %3418 = vrcp.f32 %v378_v0 }
 0x314   :  { %3420 = vrcp.f32 %v377_v2 }
 0x31b   :  { %v3415_v6 = vpop.eup %3414 }
 0x31c   :  { %v395_v8 = vmul.f32 %v3415_v6, %v394_v7 }
 0x31e   :  { %v399_v18 = vadd.f32 %v395_v8, %v387_v10 }
 0x31f   :  { %v3417_v9 = vpop.eup %3416 }
 0x320   :  { %v396_v14 = vmul.f32 %v3417_v9, %v394_v7  ;;  %v3419_v16 = vpop.eup %3418 }
 0x321   :  { %v3421_v5 = vpop.eup %3420  ;;  %v398_v11 = vmul.f32 %v3419_v16, %v394_v7 }
 0x322   :  { %v400_v4 = vadd.f32 %v396_v14, %v388_v13  ;;  %v397_v21 = vmul.f32 %v3421_v5, %v394_v7  ;;  %v3285_v5 = vld [vmem:[#allocation3 + $0x1e8] ss:$16 sps:$4 sm:$0xff]  }
 0x323   :  { %v402_v24 = vadd.f32 %v398_v11, %v390_v12  ;;  %v3299_v11 = vld [vmem:[#allocation3 + $0x1ac] ss:$16 sps:$4 sm:$0xff]   ;;  %v3297_v12 = vld [vmem:[#allocation3 + $0x1a8] ss:$16 sps:$4 sm:$0xff]  }
 0x324   :  { %v452_v19 = vpack.c.bf16 %v400_v4, %v399_v18  ;;  %v401_v25 = vadd.f32 %v397_v21, %v389_v22  ;;  %v3287_v18 = vld [vmem:[#allocation3 + $0x1ec] ss:$16 sps:$4 sm:$0xff]   ;;  %v3303_v22 = vld [vmem:[#allocation3 + $0x188] ss:$16 sps:$4 sm:$0xff]  }
 0x325   :  { %v3281_v4 = vld [vmem:[%s3878_s2 + $0x8] sm:$0xff]  }
 0x326   :  { %647 = vmatmul.mubr.bf16.vlgmr.msra.gmra.mxu0 %v452_v19  ;;  %700 = vmatmul.mubr.bf16.vlgmr.msra.gmra.mxu1 %v452_v19  ;;  %v453_v26 = vpack.c.bf16 %v402_v24, %v401_v25  ;;  %v3305_v21 = vld [vmem:[#allocation3 + $0x18c] ss:$16 sps:$4 sm:$0xff]   ;;  %v3309_v24 = vld [vmem:[#allocation3 + $0x168] ss:$16 sps:$4 sm:$0xff]   ;;  %v3314_v25 = vld [vmem:[#allocation3 + $0x144] ss:$16 sps:$4 sm:$0xff]  }
 0x327   :  { %2993 = vmatpush3.bf16.msra.mxu0 %v3264_v44  ;;  %656 = vmatprep.mubr.bf16.mxu0 %v3452_v37 }
 0x328   :  { %2994 = vmatprep.subr.bf16.mxu0 %v3265_v20  ;;  %709 = vmatprep.mubr.bf16.mxu1 %v3452_v37 }
 0x32b   :  { %2995 = vmatpush3.bf16.msra.mxu0 %v3265_v20  ;;  %v3291_v20 = vld [vmem:[#allocation3 + $0x1c8] ss:$16 sps:$4 sm:$0xff]  }
 0x32c   :  { %2996 = vmatprep.subr.bf16.mxu0 %v3266_v23 }
 0x32e   :  { %657 = vmatmul.mubr.bf16.gmra.mxu0 %v453_v26  ;;  %710 = vmatmul.mubr.bf16.gmra.mxu1 %v453_v26 }
 0x32f   :  { %2997 = vmatpush3.bf16.msra.mxu0 %v3266_v23  ;;  %3008 = vmatprep.mubr.bf16.mxu0 %v452_v19  ;;  %v3293_v19 = vld [vmem:[#allocation3 + $0x1cc] ss:$16 sps:$4 sm:$0xff]  }
 0x330   :  { %2998 = vmatprep.subr.bf16.mxu0 %v3267_v27  ;;  %3028 = vmatprep.mubr.bf16.mxu1 %v3280_v32  ;;  %v3311_v23 = vld [vmem:[#allocation3 + $0x16c] ss:$16 sps:$4 sm:$0xff]   ;;  %v3321_v32 = vld [vmem:[#allocation3 + $0x128] ss:$16 sps:$4 sm:$0xff]  }
 0x333   :  { %2999 = vmatpush3.bf16.msra.mxu0 %v3267_v27  ;;  %v3317_v27 = vld [vmem:[#allocation3 + $0x14c] ss:$16 sps:$4 sm:$0xff]  }
 0x334   :  { %3000 = vmatprep.subr.bf16.mxu0 %v3268_v28 }
 0x337   :  { %3001 = vmatpush3.bf16.msra.mxu0 %v3268_v28  ;;  %v3315_v28 = vld [vmem:[#allocation3 + $0x148] ss:$16 sps:$4 sm:$0xff]  }
 0x338   :  { %3002 = vmatprep.subr.bf16.mxu0 %v3269_v29 }
 0x33b   :  { %3003 = vmatpush3.bf16.msra.mxu0 %v3269_v29  ;;  %v3320_v29 = vld [vmem:[#allocation3 + $0x124] ss:$16 sps:$4 sm:$0xff]  }
 0x33c   :  { %3004 = vmatprep.subr.bf16.mxu0 %v3270_v30 }
 0x33f   :  { %3005 = vmatpush3.bf16.msra.mxu0 %v3270_v30  ;;  %v3318_v30 = vld [vmem:[#allocation3 + $0x120] ss:$16 sps:$4 sm:$0xff]  }
 0x340   :  { %3006 = vmatprep.subr.bf16.mxu0 %v3271_v31 }
 0x343   :  { %3007 = vmatpush3.bf16.msra.mxu0 %v3271_v31  ;;  %v3323_v31 = vld [vmem:[#allocation3 + $0x12c] ss:$16 sps:$4 sm:$0xff]  }
 0x344   :  { %1250 = vmatprep.subr.bf16.mxu0 %v3284_v34  ;;  %v3324_v34 = vld [vmem:[#allocation3 + $0x100] ss:$16 sps:$4 sm:$0xff]  }
 0x346   :  { %3009 = vmatmul.mubr.bf16.vlgmr.msra.gmra.mxu0 %v453_v26  ;;  %v3312_v26 = vld [vmem:[#allocation3 + $0x140] ss:$16 sps:$4 sm:$0xff]  }
 0x347   :  { %1282 = vmatprep.mubr.bf16.mxu0 %v3452_v37  ;;  %1251 = vmatpush1.bf16.msra.mxu0 %v3282_v33  ;;  %v3326_v33 = vld [vmem:[#allocation3 + $0x104] ss:$16 sps:$4 sm:$0xff]  }
 0x348   :  { %1252 = vmatprep.subr.bf16.mxu0 %v3290_v35  ;;  %v3329_v35 = vld [vmem:[#allocation3 + $0x10c] ss:$16 sps:$4 sm:$0xff]  }
 0x34b   :  { %1253 = vmatpush1.bf16.msra.mxu0 %v3288_v36  ;;  %v3327_v36 = vld [vmem:[#allocation3 + $0x108] ss:$16 sps:$4 sm:$0xff]  }
 0x34c   :  { %1254 = vmatprep.subr.bf16.mxu0 %v3296_v38  ;;  %v3330_v38 = vld [vmem:[%s3881_s5 + $0xf8] sm:$0xff]  }
 0x34f   :  { %1255 = vmatpush1.bf16.msra.mxu0 %v3294_v39 }
 0x350   :  { %1256 = vmatprep.subr.bf16.mxu0 %v3302_v40 }
 0x353   :  { %1257 = vmatpush1.bf16.msra.mxu0 %v3300_v41 }
 0x354   :  { %1258 = vmatprep.subr.bf16.mxu0 %v3308_v42  ;;  %v1028_v42 = vsub.s32 3, %v3548_v15 }
 0x357   :  { %1259 = vmatpush1.bf16.msra.mxu0 %v3306_v43 }
 0x358   :  { %1260 = vmatprep.subr.bf16.mxu0 %v3314_v25 }
 0x35b   :  { %1261 = vmatpush1.bf16.msra.mxu0 %v3312_v26 }
 0x35c   :  { %1262 = vmatprep.subr.bf16.mxu0 %v3320_v29 }
 0x35f   :  { %1263 = vmatpush1.bf16.msra.mxu0 %v3318_v30 }
 0x360   :  { %1264 = vmatprep.subr.bf16.mxu0 %v3326_v33 }
 0x363   :  { %1265 = vmatpush1.bf16.msra.mxu0 %v3324_v34 }
 0x364   :  { %3032 = vmatprep.subr.bf16.mxu0 %v3330_v38 }
 0x3e6   :  { %v648_v44 = vpop.f32.mrf.mxu0  ;;  %v701_v45 = vpop.f32.mrf.mxu1 }
 0x3e8   :  { %v650_v46 = vpop.f32.mrf.mxu0  ;;  %v703_v47 = vpop.f32.mrf.mxu1 }
 0x3ea   :  { %v652_v48 = vpop.f32.mrf.mxu0  ;;  %v705_v49 = vpop.f32.mrf.mxu1 }
 0x3eb   :  { %v2746_v50 = vpack.c.bf16 %v652_v48, %v648_v44  ;;  %v2766_v51 = vpack.c.bf16 %v705_v49, %v701_v45 }
 0x3ec   :  { %v654_v52 = vpop.f32.mrf.mxu0  ;;  %v707_v53 = vpop.f32.mrf.mxu1 }
 0x3ed   :  { %2747 = vst [vmem:[#allocation2] sm:$0xff] %v2746_v50   ;;  %2826 = vst [vmem:[#allocation2 + $0x20] sm:$0xff] %v2766_v51   ;;  %v2756_v54 = vpack.c.bf16 %v654_v52, %v650_v46  ;;  %v2776_v55 = vpack.c.bf16 %v707_v53, %v703_v47  ;;  %v1029_v47 = vrot.slane %v3554_v17, %v1028_v42 }
 0x3ee   :  { %v658_v56 = vpop.f32.mrf.mxu0  ;;  %v711_v57 = vpop.f32.mrf.mxu1 }
 0x3ef   :  { %2824 = vst [vmem:[#allocation2 + $0x10] sm:$0xff] %v2756_v54   ;;  %2828 = vst [vmem:[#allocation2 + $0x30] sm:$0xff] %v2776_v55  }
 0x3f0   :  { %v660_v58 = vpop.f32.mrf.mxu0  ;;  %v713_v59 = vpop.f32.mrf.mxu1 }
 0x3f2   :  { %v662_v60 = vpop.f32.mrf.mxu0  ;;  %v715_v61 = vpop.f32.mrf.mxu1 }
 0x3f3   :  { %v2751_v62 = vpack.c.bf16 %v662_v60, %v658_v56  ;;  %v2771_v63 = vpack.c.bf16 %v715_v61, %v711_v57  ;;  %v3332_v61 = vld [vmem:[%s3881_s5 + $0xe8] sm:$0xff]  }
 0x3f4   :  { %v664_v0 = vpop.f32.mrf.mxu0  ;;  %v717_v1 = vpop.f32.mrf.mxu1  ;;  %v3275_v9 = vld [vmem:[#allocation2 + $0x20] sm:$0xff]  }
 0x3f5   :  { %2823 = vst [vmem:[#allocation2 + $0x8] sm:$0xff] %v2751_v62   ;;  %2827 = vst [vmem:[#allocation2 + $0x28] sm:$0xff] %v2771_v63   ;;  %v2761_v2 = vpack.c.bf16 %v664_v0, %v660_v58  ;;  %v2781_v3 = vpack.c.bf16 %v717_v1, %v713_v59  ;;  %v3279_v16 = vld [vmem:[#allocation2] sm:$0xff]   ;;  %v3331_v59 = vld [vmem:[%s3881_s5 + $0xf0] sm:$0xff]  }
 0x3f6   :  { %v3273_v7 = vld [vmem:[#allocation2 + $0x30] sm:$0xff]   ;;  %v3333_v0 = vld [vmem:[%s3881_s5 + $0xe0] sm:$0xff]  }
 0x3f7   :  { %2825 = vst [vmem:[#allocation2 + $0x18] sm:$0xff] %v2761_v2   ;;  %2829 = vst [vmem:[#allocation2 + $0x38] sm:$0xff] %v2781_v3   ;;  %v3277_v13 = vld [vmem:[#allocation2 + $0x10] sm:$0xff]   ;;  %v3336_v2 = vld [vmem:[%s3881_s5 + $0xc8] sm:$0xff]  }
 0x3f8   :  { %v3335_v1 = vld [vmem:[%s3881_s5 + $0xd0] sm:$0xff]   ;;  %v3337_v3 = vld [vmem:[%s3881_s5 + $0xc0] sm:$0xff]  }
 0x3fc   :  { %v3274_v8 = vld [vmem:[#allocation2 + $0x28] sm:$0xff]  }
 0x3fd   :  { %v3278_v14 = vld [vmem:[#allocation2 + $0x8] sm:$0xff]  }
 0x3fe   :  { %v3272_v6 = vld [vmem:[#allocation2 + $0x38] sm:$0xff]  }
 0x3ff   :  { %3012 = vmatprep.subr.bf16.mxu1 %v3272_v6  ;;  %v3276_v10 = vld [vmem:[#allocation2 + $0x18] sm:$0xff]  }
 0x400   :  { %3013 = vmatpush3.bf16.msra.mxu1 %v3272_v6  ;;  %v3338_v6 = vld [vmem:[%s3881_s5 + $0x138] sm:$0xff]  }
 0x401   :  { %3014 = vmatprep.subr.bf16.mxu1 %v3273_v7 }
 0x404   :  { %3015 = vmatpush3.bf16.msra.mxu1 %v3273_v7  ;;  %v3453_v7 = vmov 0.0  }
 0x405   :  { %3016 = vmatprep.subr.bf16.mxu1 %v3274_v8 }
 0x406   :  { %v3010_v39 = vpop.f32.mrf.mxu0 }
 0x408   :  { %3017 = vmatpush3.bf16.msra.mxu1 %v3274_v8  ;;  %v902_v40 = vpop.f32.mrf.mxu0  ;;  %v3339_v8 = vld [vmem:[%s3881_s5 + $0x130] sm:$0xff]  }
 0x409   :  { %3018 = vmatprep.subr.bf16.mxu1 %v3275_v9 }
 0x40a   :  { %v3011_v43 = vpop.f32.mrf.mxu0 }
 0x40c   :  { %3019 = vmatpush3.bf16.msra.mxu1 %v3275_v9  ;;  %v905_v48 = vpop.f32.mrf.mxu0  ;;  %v3340_v9 = vld [vmem:[%s3881_s5 + $0x128] sm:$0xff]  }
 0x40d   :  { %3020 = vmatprep.subr.bf16.mxu1 %v3276_v10 }
 0x410   :  { %3021 = vmatpush3.bf16.msra.mxu1 %v3276_v10  ;;  %v3341_v10 = vld [vmem:[%s3881_s5 + $0x120] sm:$0xff]  }
 0x411   :  { %3022 = vmatprep.subr.bf16.mxu1 %v3277_v13 }
 0x414   :  { %3023 = vmatpush3.bf16.msra.mxu1 %v3277_v13  ;;  %v3342_v13 = vld [vmem:[%s3881_s5 + $0x118] sm:$0xff]  }
 0x415   :  { %3024 = vmatprep.subr.bf16.mxu1 %v3278_v14 }
 0x418   :  { %3025 = vmatpush3.bf16.msra.mxu1 %v3278_v14  ;;  %v3343_v14 = vld [vmem:[%s3881_s5 + $0x110] sm:$0xff]  }
 0x419   :  { %3026 = vmatprep.subr.bf16.mxu1 %v3279_v16 }
 0x41c   :  { %3027 = vmatpush3.bf16.msra.mxu1 %v3279_v16  ;;  %v3344_v16 = vld [vmem:[%s3881_s5 + $0x108] sm:$0xff]  }
 0x41d   :  { %1303 = vmatprep.subr.bf16.mxu1 %v3287_v18  ;;  %v3345_v18 = vld [vmem:[%s3881_s5 + $0x100] sm:$0xff]  }
 0x41f   :  { %3029 = vmatmul.mubr.bf16.vlgmr.msra.gmra.mxu1 %v3281_v4  ;;  %v42_v4 = vld [vmem:[%s3880_s4 + $0x8] sm:$0xff] }
 0x420   :  { %1304 = vmatpush1.bf16.msra.mxu1 %v3285_v5  ;;  %1335 = vmatprep.mubr.bf16.mxu1 %v3452_v37  ;;  %v43_v5 = vpack.c.bf16 %v42_v4, %v42_v4  ;;  %v3373_v4 = vld [vmem:[%s3881_s5 + $0x180] sm:$0xff]  }
 0x421   :  { %1305 = vmatprep.subr.bf16.mxu1 %v3293_v19  ;;  %v3354_v19 = vld [vmem:[%s3878_s2] sm:$0xff]  }
 0x424   :  { %1306 = vmatpush1.bf16.msra.mxu1 %v3291_v20 }
 0x425   :  { %1307 = vmatprep.subr.bf16.mxu1 %v3299_v11 }
 0x428   :  { %1308 = vmatpush1.bf16.msra.mxu1 %v3297_v12 }
 0x429   :  { %1309 = vmatprep.subr.bf16.mxu1 %v3305_v21 }
 0x42c   :  { %1310 = vmatpush1.bf16.msra.mxu1 %v3303_v22 }
 0x42d   :  { %1311 = vmatprep.subr.bf16.mxu1 %v3311_v23 }
 0x430   :  { %1312 = vmatpush1.bf16.msra.mxu1 %v3309_v24 }
 0x431   :  { %1313 = vmatprep.subr.bf16.mxu1 %v3317_v27 }
 0x434   :  { %1314 = vmatpush1.bf16.msra.mxu1 %v3315_v28 }
 0x435   :  { %1315 = vmatprep.subr.bf16.mxu1 %v3323_v31 }
 0x438   :  { %1316 = vmatpush1.bf16.msra.mxu1 %v3321_v32 }
 0x439   :  { %1317 = vmatprep.subr.bf16.mxu1 %v3329_v35 }
 0x43c   :  { %1318 = vmatpush1.bf16.msra.mxu1 %v3327_v36 }
 0x4df   :  { %v3030_v41 = vpop.f32.mrf.mxu1 }
 0x4e0   :  { %v1020_v54 = vadd.f32 %v3030_v41, %v3010_v39 }
 0x4e1   :  { %v1011_v44 = vpop.f32.mrf.mxu1 }
 0x4e2   :  { %v1012_v45 = vadd.f32 %v1011_v44, %v902_v40  ;;  %v1032_v60 = vadd.f32 %v1029_v47, %v1020_v54  ;;  %v3356_v54 = vld [vmem:[%s3881_s5 + $0x178] sm:$0xff]  }
 0x4e3   :  { %v3031_v46 = vpop.f32.mrf.mxu1 }
 0x4e4   :  { %v1030_v50 = vadd.f32 %v1029_v47, %v1012_v45  ;;  %v1023_v52 = vadd.f32 %v3031_v46, %v3011_v43  ;;  %v1036_v62 = vmax.f32 %v1032_v60, 0.0 }
 0x4e5   :  { %v1014_v49 = vpop.f32.mrf.mxu1 }
 0x4e6   :  { %v1015_v51 = vadd.f32 %v1014_v49, %v905_v48  ;;  %v1034_v55 = vmax.f32 %v1030_v50, 0.0  ;;  %v1033_v57 = vadd.f32 %v1029_v47, %v1023_v52 }
 0x4e8   :  { %v1031_v53 = vadd.f32 %v1029_v47, %v1015_v51  ;;  %v1037_v17 = vmax.f32 %v1033_v57, 0.0 }
 0x4ea   :  { %v1035_v56 = vmax.f32 %v1031_v53, 0.0  ;;  %v3656_v63 = vpack.c.bf16 %v1037_v17, %v1036_v62  ;;  %v3355_v53 = vld [vmem:[%s3878_s2 + $0x8] sm:$0xff]  }
 0x4ec   :  { %v3644_v58 = vpack.c.bf16 %v1035_v56, %v1034_v55  ;;  %v3357_v56 = vld [vmem:[%s3881_s5 + $0x170] sm:$0xff]  }
 0x4ee   :  { %1283 = vmatmul.mubr.bf16.vlgmr.msra.gmra.mxu0 %v3644_v58  ;;  %1336 = vmatmul.mubr.bf16.vlgmr.msra.gmra.mxu1 %v3644_v58 }
 0x4ef   :  { %3033 = vmatpush3.bf16.msra.mxu0 %v3330_v38  ;;  %1292 = vmatprep.mubr.bf16.mxu0 %v3452_v37 }
 0x4f0   :  { %3034 = vmatprep.subr.bf16.mxu0 %v3331_v59  ;;  %1345 = vmatprep.mubr.bf16.mxu1 %v3452_v37  ;;  %v3334_v37 = vld [vmem:[%s3881_s5 + $0xd8] sm:$0xff]  }
 0x4f3   :  { %3035 = vmatpush3.bf16.msra.mxu0 %v3331_v59  ;;  %v3358_v59 = vld [vmem:[%s3881_s5 + $0x168] sm:$0xff]  }
 0x4f4   :  { %3036 = vmatprep.subr.bf16.mxu0 %v3332_v61 }
 0x4f6   :  { %1293 = vmatmul.mubr.bf16.gmra.mxu0 %v3656_v63  ;;  %1346 = vmatmul.mubr.bf16.gmra.mxu1 %v3656_v63 }
 0x4f7   :  { %3037 = vmatpush3.bf16.msra.mxu0 %v3332_v61  ;;  %3048 = vmatprep.mubr.bf16.mxu0 %v3644_v58  ;;  %v3359_v61 = vld [vmem:[%s3881_s5 + $0x160] sm:$0xff]  }
 0x4f8   :  { %3038 = vmatprep.subr.bf16.mxu0 %v3333_v0  ;;  %3068 = vmatprep.mubr.bf16.mxu1 %v3354_v19  ;;  %v1664_v19 = vsub.s32 4, %v3548_v15 }
 0x4fb   :  { %3039 = vmatpush3.bf16.msra.mxu0 %v3333_v0 }
 0x4fc   :  { %3040 = vmatprep.subr.bf16.mxu0 %v3334_v37 }
 0x4ff   :  { %3041 = vmatpush3.bf16.msra.mxu0 %v3334_v37  ;;  %v3360_v37 = vld [vmem:[%s3881_s5 + $0x158] sm:$0xff]  }
 0x500   :  { %3042 = vmatprep.subr.bf16.mxu0 %v3335_v1 }
 0x503   :  { %3043 = vmatpush3.bf16.msra.mxu0 %v3335_v1  ;;  %v3361_v1 = vld [vmem:[%s3881_s5 + $0x150] sm:$0xff]  }
 0x504   :  { %3044 = vmatprep.subr.bf16.mxu0 %v3336_v2 }
 0x507   :  { %3045 = vmatpush3.bf16.msra.mxu0 %v3336_v2  ;;  %v3362_v2 = vld [vmem:[%s3881_s5 + $0x148] sm:$0xff]  }
 0x508   :  { %3046 = vmatprep.subr.bf16.mxu0 %v3337_v3 }
 0x50b   :  { %3047 = vmatpush3.bf16.msra.mxu0 %v3337_v3  ;;  %v3363_v3 = vld [vmem:[%s3881_s5 + $0x140] sm:$0xff]  }
 0x50c   :  { %3072 = vmatprep.subr.bf16.mxu0 %v3453_v7 }
 0x50e   :  { %3049 = vmatmul.mubr.bf16.vlgmr.msra.gmra.mxu0 %v3656_v63 }
 0x50f   :  { %3073 = vmatpush3.bf16.msra.mxu0 %v3338_v6  ;;  %3088 = vmatprep.mubr.msk.bf16.mxu0 %vm3454_vm0, %v3453_v7 }
 0x510   :  { %3074 = vmatprep.subr.bf16.mxu0 %v3453_v7 }
 0x513   :  { %3075 = vmatpush3.bf16.msra.mxu0 %v3339_v8  ;;  %v3364_v8 = vld [vmem:[%s3879_s3] sm:$0xff]  }
 0x514   :  { %3076 = vmatprep.subr.bf16.mxu0 %v3453_v7 }
 0x517   :  { %3077 = vmatpush3.bf16.msra.mxu0 %v3340_v9  ;;  %v3365_v9 = vld [vmem:[%s3879_s3 + $0x8] ss:$0 sps:$4 sm:$0xff]  }
 0x518   :  { %3078 = vmatprep.subr.bf16.mxu0 %v3453_v7 }
 0x51b   :  { %3079 = vmatpush3.bf16.msra.mxu0 %v3341_v10  ;;  %v3368_v10 = vld [vmem:[%s3881_s5 + $0x1a8] sm:$0xff]  }
 0x51c   :  { %3080 = vmatprep.subr.bf16.mxu0 %v3453_v7 }
 0x51f   :  { %3081 = vmatpush3.bf16.msra.mxu0 %v3342_v13  ;;  %v3369_v13 = vld [vmem:[%s3881_s5 + $0x1a0] sm:$0xff]  }
 0x520   :  { %3082 = vmatprep.subr.bf16.mxu0 %v3453_v7 }
 0x523   :  { %3083 = vmatpush3.bf16.msra.mxu0 %v3343_v14  ;;  %v3370_v14 = vld [vmem:[%s3881_s5 + $0x198] sm:$0xff]  }
 0x524   :  { %3084 = vmatprep.subr.bf16.mxu0 %v3453_v7 }
 0x527   :  { %3085 = vmatpush3.bf16.msra.mxu0 %v3344_v16  ;;  %v3371_v16 = vld [vmem:[%s3881_s5 + $0x190] sm:$0xff]  }
 0x528   :  { %3086 = vmatprep.subr.bf16.mxu0 %v3453_v7 }
 0x52b   :  { %3087 = vmatpush3.bf16.msra.mxu0 %v3345_v18  ;;  %v3372_v18 = vld [vmem:[%s3881_s5 + $0x188] sm:$0xff]  }
 0x52c   :  { %3112 = vmatprep.subr.bf16.mxu0 %v3453_v7 }
 0x52e   :  { %3089 = vmatmul.mubr.bf16.vlgmr.msra.gmra.mxu0 %v43_v5  ;;  %v3374_v5 = vld [vmem:[%s3881_s5 + $0x1f8] sm:$0xff]  }
 0x52f   :  { %3128 = vmatprep.mubr.msk.bf16.mxu0 %vm3454_vm0, %v3453_v7 }
 0x5ae   :  { %v1284_v20 = vpop.f32.mrf.mxu0  ;;  %v1337_v11 = vpop.f32.mrf.mxu1 }
 0x5b0   :  { %v1286_v12 = vpop.f32.mrf.mxu0  ;;  %v1339_v21 = vpop.f32.mrf.mxu1 }
 0x5b2   :  { %v1288_v22 = vpop.f32.mrf.mxu0  ;;  %v1341_v23 = vpop.f32.mrf.mxu1 }
 0x5b3   :  { %v2786_v24 = vpack.c.bf16 %v1288_v22, %v1284_v20  ;;  %v2806_v25 = vpack.c.bf16 %v1341_v23, %v1337_v11 }
 0x5b4   :  { %v1290_v26 = vpop.f32.mrf.mxu0  ;;  %v1343_v27 = vpop.f32.mrf.mxu1 }
 0x5b5   :  { %2787 = vst [vmem:[#allocation2] sm:$0xff] %v2786_v24   ;;  %2833 = vst [vmem:[#allocation2 + $0x20] sm:$0xff] %v2806_v25   ;;  %v2796_v28 = vpack.c.bf16 %v1290_v26, %v1286_v12  ;;  %v2816_v29 = vpack.c.bf16 %v1343_v27, %v1339_v21  ;;  %v3817_v12 = vld [vmem:[%s3880_s4] sm:$0xff] }
 0x5b6   :  { %v1294_v30 = vpop.f32.mrf.mxu0  ;;  %v1347_v31 = vpop.f32.mrf.mxu1  ;;  %v1665_v21 = vrot.slane %v3817_v12, %v1664_v19 }
 0x5b7   :  { %2831 = vst [vmem:[#allocation2 + $0x10] sm:$0xff] %v2796_v28   ;;  %2835 = vst [vmem:[#allocation2 + $0x30] sm:$0xff] %v2816_v29  }
 0x5b8   :  { %v1296_v32 = vpop.f32.mrf.mxu0  ;;  %v1349_v33 = vpop.f32.mrf.mxu1 }
 0x5ba   :  { %v1298_v34 = vpop.f32.mrf.mxu0  ;;  %v1351_v35 = vpop.f32.mrf.mxu1 }
 0x5bb   :  { %v2791_v36 = vpack.c.bf16 %v1298_v34, %v1294_v30  ;;  %v2811_v38 = vpack.c.bf16 %v1351_v35, %v1347_v31 }
 0x5bc   :  { %v1300_v39 = vpop.f32.mrf.mxu0  ;;  %v1353_v40 = vpop.f32.mrf.mxu1  ;;  %v3349_v46 = vld [vmem:[#allocation2 + $0x20] sm:$0xff]  }
 0x5bd   :  { %2830 = vst [vmem:[#allocation2 + $0x8] sm:$0xff] %v2791_v36   ;;  %2834 = vst [vmem:[#allocation2 + $0x28] sm:$0xff] %v2811_v38   ;;  %v2801_v41 = vpack.c.bf16 %v1300_v39, %v1296_v32  ;;  %v2821_v42 = vpack.c.bf16 %v1353_v40, %v1349_v33  ;;  %v3353_v51 = vld [vmem:[#allocation2] sm:$0xff]   ;;  %v3379_v38 = vld [vmem:[%s3881_s5 + $0x238] sm:$0xff]  }
 0x5be   :  { %v3347_v44 = vld [vmem:[#allocation2 + $0x30] sm:$0xff]   ;;  %v3383_v40 = vld [vmem:[%s3881_s5 + $0x228] sm:$0xff]  }
 0x5bf   :  { %2832 = vst [vmem:[#allocation2 + $0x18] sm:$0xff] %v2801_v41   ;;  %2836 = vst [vmem:[#allocation2 + $0x38] sm:$0xff] %v2821_v42   ;;  %v3351_v48 = vld [vmem:[#allocation2 + $0x10] sm:$0xff]   ;;  %v3385_v41 = vld [vmem:[%s3881_s5 + $0x220] sm:$0xff]  }
 0x5c0   :  { %v3381_v39 = vld [vmem:[%s3881_s5 + $0x230] sm:$0xff]   ;;  %v3386_v42 = vld [vmem:[%s3881_s5 + $0x218] sm:$0xff]  }
 0x5c4   :  { %v3348_v45 = vld [vmem:[#allocation2 + $0x28] sm:$0xff]  }
 0x5c5   :  { %v3352_v49 = vld [vmem:[#allocation2 + $0x8] sm:$0xff]  }
 0x5c6   :  { %v3346_v43 = vld [vmem:[#allocation2 + $0x38] sm:$0xff]  }
 0x5c7   :  { %3052 = vmatprep.subr.bf16.mxu1 %v3346_v43  ;;  %v3350_v47 = vld [vmem:[#allocation2 + $0x18] sm:$0xff]  }
 0x5c8   :  { %3053 = vmatpush3.bf16.msra.mxu1 %v3346_v43 }
 0x5c9   :  { %3054 = vmatprep.subr.bf16.mxu1 %v3347_v44 }
 0x5cc   :  { %3055 = vmatpush3.bf16.msra.mxu1 %v3347_v44 }
 0x5cd   :  { %3056 = vmatprep.subr.bf16.mxu1 %v3348_v45 }
 0x5ce   :  { %v3720_v50 = vpop.f32.mrf.mxu0 }
 0x5d0   :  { %3057 = vmatpush3.bf16.msra.mxu1 %v3348_v45  ;;  %v3722_v52 = vpop.f32.mrf.mxu0  ;;  %v3387_v45 = vld [vmem:[%s3881_s5 + $0x210] sm:$0xff]  }
 0x5d1   :  { %3058 = vmatprep.subr.bf16.mxu1 %v3349_v46 }
 0x5d2   :  { %v3731_v55 = vpop.f32.mrf.mxu0 }
 0x5d4   :  { %3059 = vmatpush3.bf16.msra.mxu1 %v3349_v46  ;;  %v3739_v57 = vpop.f32.mrf.mxu0 }
 0x5d5   :  { %3060 = vmatprep.subr.bf16.mxu1 %v3350_v47 }
 0x5d8   :  { %3061 = vmatpush3.bf16.msra.mxu1 %v3350_v47 }
 0x5d9   :  { %3062 = vmatprep.subr.bf16.mxu1 %v3351_v48 }
 0x5dc   :  { %3063 = vmatpush3.bf16.msra.mxu1 %v3351_v48 }
 0x5dd   :  { %3064 = vmatprep.subr.bf16.mxu1 %v3352_v49 }
 0x5e0   :  { %3065 = vmatpush3.bf16.msra.mxu1 %v3352_v49 }
 0x5e1   :  { %3066 = vmatprep.subr.bf16.mxu1 %v3353_v51 }
 0x5e4   :  { %3067 = vmatpush3.bf16.msra.mxu1 %v3353_v51  ;;  %v3376_v51 = vld [vmem:[%s3881_s5 + $0x1e8] sm:$0xff]  }
 0x5e5   :  { %3092 = vmatprep.subr.bf16.mxu1 %v3453_v7 }
 0x5e7   :  { %3069 = vmatmul.mubr.bf16.vlgmr.msra.gmra.mxu1 %v3355_v53  ;;  %v3378_v53 = vld [vmem:[%s3881_s5 + $0x1d8] sm:$0xff]  }
 0x5e8   :  { %3093 = vmatpush3.bf16.msra.mxu1 %v3356_v54  ;;  %3108 = vmatprep.mubr.msk.bf16.mxu1 %vm3454_vm0, %v3453_v7  ;;  %v3380_v54 = vld [vmem:[%s3881_s5 + $0x1d0] sm:$0xff]  }
 0x5e9   :  { %3094 = vmatprep.subr.bf16.mxu1 %v3453_v7 }
 0x5ec   :  { %3095 = vmatpush3.bf16.msra.mxu1 %v3357_v56 }
 0x5ed   :  { %3096 = vmatprep.subr.bf16.mxu1 %v3453_v7 }
 0x5ee   :  { %v1773_v60 = vpop.f32.mrf.mxu0 }
 0x5ef   :  { %v1779_v6 = vpack.c.bf16 %v1773_v60, %v1773_v60 }
 0x5f0   :  { %v3090_v17 = vpop.f32.mrf.mxu0  ;;  %3097 = vmatpush3.bf16.msra.mxu1 %v3358_v59 }
 0x5f1   :  { %3098 = vmatprep.subr.bf16.mxu1 %v3453_v7  ;;  %v3384_v17 = vld [vmem:[%s3881_s5 + $0x1c0] sm:$0xff]  }
 0x5f2   :  { %v1776_v62 = vpop.f32.mrf.mxu0 }
 0x5f4   :  { %v3091_v0 = vpop.f32.mrf.mxu0  ;;  %3099 = vmatpush3.bf16.msra.mxu1 %v3359_v61 }
 0x5f5   :  { %3100 = vmatprep.subr.bf16.mxu1 %v3453_v7  ;;  %v3388_v0 = vld [vmem:[%s3881_s5 + $0x208] sm:$0xff]  }
 0x5f8   :  { %3101 = vmatpush3.bf16.msra.mxu1 %v3360_v37  ;;  %v3389_v37 = vld [vmem:[%s3881_s5 + $0x200] sm:$0xff]  }
 0x5f9   :  { %3102 = vmatprep.subr.bf16.mxu1 %v3453_v7 }
 0x5fc   :  { %3103 = vmatpush3.bf16.msra.mxu1 %v3361_v1 }
 0x5fd   :  { %3104 = vmatprep.subr.bf16.mxu1 %v3453_v7 }
 0x600   :  { %3105 = vmatpush3.bf16.msra.mxu1 %v3362_v2 }
 0x601   :  { %3106 = vmatprep.subr.bf16.mxu1 %v3453_v7 }
 0x604   :  { %3107 = vmatpush3.bf16.msra.mxu1 %v3363_v3 }
 0x605   :  { %3132 = vmatprep.subr.bf16.mxu1 %v3656_v63 }
 0x607   :  { %3109 = vmatmul.mubr.bf16.vlgmr.msra.gmra.mxu1 %v1779_v6 }
 0x608   :  { %3133 = vmatpush3.bf16.msra.mxu1 %v3656_v63  ;;  %3136 = vmatprep.mubr.msk.bf16.mxu1 %vm2011_vm1, %v3364_v8  ;;  %v3366_v63 = vld [vmem:[%s3881_s5 + $0x1b8] sm:$0xff]  }
 0x609   :  { %3134 = vmatprep.subr.bf16.mxu1 %v3644_v58  ;;  %3113 = vmatpush3.bf16.msra.mxu0 %v3366_v63 }
 0x60a   :  { %3114 = vmatprep.subr.bf16.mxu0 %v3453_v7 }
 0x60c   :  { %3135 = vmatpush3.bf16.msra.mxu1 %v3644_v58  ;;  %v3367_v58 = vld [vmem:[%s3881_s5 + $0x1b0] sm:$0xff]  }
 0x60d   :  { %3115 = vmatpush3.bf16.msra.mxu0 %v3367_v58 }
 0x60e   :  { %3116 = vmatprep.subr.bf16.mxu0 %v3453_v7 }
 0x60f   :  { %3137 = vmatmul.mubr.msk.bf16.vlgmr.msra.gmra.mxu1 %vm2011_vm1, %v3365_v9 }
 0x610   :  { %3144 = vmatprep.mubr.msk.bf16.mxu1 %vm2011_vm1, %v3364_v8 }
 0x611   :  { %3117 = vmatpush3.bf16.msra.mxu0 %v3368_v10 }
 0x612   :  { %3118 = vmatprep.subr.bf16.mxu0 %v3453_v7 }
 0x615   :  { %3119 = vmatpush3.bf16.msra.mxu0 %v3369_v13 }
 0x616   :  { %3120 = vmatprep.subr.bf16.mxu0 %v3453_v7 }
 0x619   :  { %3121 = vmatpush3.bf16.msra.mxu0 %v3370_v14  ;;  %v1995_v14 = vsub.s32 6, %v3548_v15 }
 0x61a   :  { %3122 = vmatprep.subr.bf16.mxu0 %v3453_v7 }
 0x61d   :  { %3123 = vmatpush3.bf16.msra.mxu0 %v3371_v16  ;;  %v1996_v16 = vrot.slane %v3817_v12, %v1995_v14 }
 0x61e   :  { %3124 = vmatprep.subr.bf16.mxu0 %v3453_v7 }
 0x621   :  { %3125 = vmatpush3.bf16.msra.mxu0 %v3372_v18 }
 0x622   :  { %3126 = vmatprep.subr.bf16.mxu0 %v3453_v7 }
 0x625   :  { %3127 = vmatpush3.bf16.msra.mxu0 %v3373_v4 }
 0x626   :  { %3168 = vmatprep.subr.bf16.mxu0 %v3374_v5 }
 0x6a7   :  { %v3070_v20 = vpop.f32.mrf.mxu1 }
 0x6a8   :  { %v1656_v11 = vadd.f32 %v3070_v20, %v3720_v50  ;;  %v3375_v50 = vld [vmem:[%s3881_s5 + $0x1f0] sm:$0xff]  }
 0x6a9   :  { %v1647_v22 = vpop.f32.mrf.mxu1 }
 0x6aa   :  { %v1648_v7 = vadd.f32 %v1647_v22, %v3722_v52  ;;  %v1668_v24 = vadd.f32 %v1665_v21, %v1656_v11  ;;  %v3377_v52 = vld [vmem:[%s3881_s5 + $0x1e0] sm:$0xff]  }
 0x6ab   :  { %v3071_v23 = vpop.f32.mrf.mxu1 }
 0x6ac   :  { %v1659_v25 = vadd.f32 %v3071_v23, %v3731_v55  ;;  %v1666_v27 = vadd.f32 %v1665_v21, %v1648_v7  ;;  %v1672_v30 = vmax.f32 %v1668_v24, 0.0 }
 0x6ad   :  { %v1650_v26 = vpop.f32.mrf.mxu1 }
 0x6ae   :  { %v1669_v28 = vadd.f32 %v1665_v21, %v1659_v25  ;;  %v1651_v29 = vadd.f32 %v1650_v26, %v3739_v57  ;;  %v1670_v33 = vmax.f32 %v1666_v27, 0.0  ;;  %v3382_v57 = vld [vmem:[%s3881_s5 + $0x1c8] sm:$0xff]   ;;  %s3455_s5 = smov 126  }
 0x6b0   :  { %v1673_v31 = vmax.f32 %v1669_v28, 0.0  ;;  %v1667_v32 = vadd.f32 %v1665_v21, %v1651_v29 }
 0x6b2   :  { %v1671_v34 = vmax.f32 %v1667_v32, 0.0  ;;  %v2067_v35 = vpack.c.bf16 %v1673_v31, %v1672_v30 }
 0x6b4   :  { %3140 = vmatprep.subr.bf16.mxu1 %v2067_v35  ;;  %v2066_v36 = vpack.c.bf16 %v1671_v34, %v1670_v33  ;;  %v2364_v33 = vsub.s32 5, %v3548_v15 }
 0x6b5   :  { %3141 = vmatpush3.bf16.msra.mxu1 %v2067_v35 }
 0x6b6   :  { %3142 = vmatprep.subr.bf16.mxu1 %v2066_v36  ;;  %v2365_v34 = vrot.slane %v3817_v12, %v2364_v33 }
 0x6b9   :  { %3143 = vmatpush3.bf16.msra.mxu1 %v2066_v36 }
 0x6ba   :  { %3148 = vmatprep.subr.bf16.mxu1 %v3379_v38 }
 0x6bc   :  { %3145 = vmatmul.mubr.msk.bf16.vlgmr.msra.gmra.mxu1 %vm2011_vm1, %v3365_v9 }
 0x6bd   :  { %3149 = vmatpush3.bf16.msra.mxu1 %v3379_v38 }
 0x6be   :  { %3150 = vmatprep.subr.bf16.mxu1 %v3381_v39 }
 0x6c1   :  { %3151 = vmatpush3.bf16.msra.mxu1 %v3381_v39 }
 0x6c2   :  { %3152 = vmatprep.subr.bf16.mxu1 %v3383_v40 }
 0x6c5   :  { %3153 = vmatpush3.bf16.msra.mxu1 %v3383_v40 }
 0x6c6   :  { %3154 = vmatprep.subr.bf16.mxu1 %v3385_v41 }
 0x6c7   :  { %v1879_v43 = vpop.f32.mrf.mxu1 }
 0x6c8   :  { %3422 = vtanh.f32 %v1879_v43 }
 0x6c9   :  { %v3110_v44 = vpop.f32.mrf.mxu1  ;;  %3155 = vmatpush3.bf16.msra.mxu1 %v3385_v41 }
 0x6ca   :  { %3156 = vmatprep.subr.bf16.mxu1 %v3386_v42 }
 0x6cb   :  { %v1882_v46 = vpop.f32.mrf.mxu1 }
 0x6cd   :  { %v3111_v47 = vpop.f32.mrf.mxu1  ;;  %3157 = vmatpush3.bf16.msra.mxu1 %v3386_v42 }
 0x6ce   :  { %3158 = vmatprep.subr.bf16.mxu1 %v3387_v45 }
 0x6cf   :  { %v3138_v55 = vpop.f32.mrf.mxu1 }
 0x6d0   :  { %v2117_v62 = vpack.c.bf16 %v3138_v55, %v3138_v55 }
 0x6d1   :  { %3159 = vmatpush3.bf16.msra.mxu1 %v3387_v45  ;;  %v2052_v56 = vpop.f32.mrf.mxu1 }
 0x6d2   :  { %3160 = vmatprep.subr.bf16.mxu1 %v3388_v0 }
 0x6d3   :  { %v3139_v59 = vpop.f32.mrf.mxu1 }
 0x6d5   :  { %v3423_v48 = vpop.eup %3422  ;;  %v2055_v60 = vpop.f32.mrf.mxu1  ;;  %3161 = vmatpush3.bf16.msra.mxu1 %v3388_v0 }
 0x6d6   :  { %v1886_v49 = vpack.c.bf16 %v3423_v48, %v3423_v48  ;;  %v2116_v61 = vpack.c.bf16 %v2055_v60, %v2052_v56  ;;  %3162 = vmatprep.subr.bf16.mxu1 %v3389_v37 }
 0x6d8   :  { %3129 = vmatmul.mubr.bf16.vlgmr.msra.gmra.mxu0 %v1886_v49 }
 0x6d9   :  { %3169 = vmatpush3.bf16.msra.mxu0 %v3374_v5  ;;  %3184 = vmatprep.mubr.bf16.mxu0 %v2116_v61 }
 0x6da   :  { %3170 = vmatprep.subr.bf16.mxu0 %v3375_v50  ;;  %3163 = vmatpush3.bf16.msra.mxu1 %v3389_v37 }
 0x6dd   :  { %3171 = vmatpush3.bf16.msra.mxu0 %v3375_v50 }
 0x6de   :  { %3172 = vmatprep.subr.bf16.mxu0 %v3376_v51 }
 0x6e1   :  { %3173 = vmatpush3.bf16.msra.mxu0 %v3376_v51 }
 0x6e2   :  { %3174 = vmatprep.subr.bf16.mxu0 %v3377_v52 }
 0x6e5   :  { %3175 = vmatpush3.bf16.msra.mxu0 %v3377_v52 }
 0x6e6   :  { %3176 = vmatprep.subr.bf16.mxu0 %v3378_v53 }
 0x6e9   :  { %3177 = vmatpush3.bf16.msra.mxu0 %v3378_v53 }
 0x6ea   :  { %3178 = vmatprep.subr.bf16.mxu0 %v3380_v54 }
 0x6ed   :  { %3179 = vmatpush3.bf16.msra.mxu0 %v3380_v54 }
 0x6ee   :  { %3180 = vmatprep.subr.bf16.mxu0 %v3382_v57 }
 0x6f1   :  { %3181 = vmatpush3.bf16.msra.mxu0 %v3382_v57 }
 0x6f2   :  { %3182 = vmatprep.subr.bf16.mxu0 %v3384_v17 }
 0x6f5   :  { %3183 = vmatpush3.bf16.msra.mxu0 %v3384_v17 }
 0x6f8   :  { %3185 = vmatmul.mubr.bf16.vlgmr.msra.gmra.mxu0 %v2117_v62 }
 0x77c   :  { %v3146_v1 = vpop.f32.mrf.mxu1 }
 0x77d   :  { %v2136_v9 = vpack.c.bf16 %v3146_v1, %v3146_v1 }
 0x77e   :  { %v2102_v2 = vpop.f32.mrf.mxu1 }
 0x780   :  { %v3147_v3 = vpop.f32.mrf.mxu1 }
 0x782   :  { %v2105_v6 = vpop.f32.mrf.mxu1 }
 0x783   :  { %v2135_v8 = vpack.c.bf16 %v2105_v6, %v2102_v2 }
 0x785   :  { %3164 = vmatprep.mubr.bf16.mxu1 %v2135_v8 }
 0x786   :  { %3165 = vmatmul.mubr.bf16.vlgmr.msra.gmra.mxu1 %v2136_v9 }
 0x798   :  { %v1986_v63 = vpop.f32.mrf.mxu0 }
 0x799   :  { %3424 = vtanh.f32 %v1986_v63 }
 0x79a   :  { %v3130_v58 = vpop.f32.mrf.mxu0 }
 0x79c   :  { %v1989_v10 = vpop.f32.mrf.mxu0 }
 0x79e   :  { %v3131_v13 = vpop.f32.mrf.mxu0 }
 0x7a6   :  { %v3425_v18 = vpop.eup %3424 }
 0x7a7   :  { %v1997_v4 = vmul.f32 %v3425_v18, %v1996_v16 }
 0x7a9   :  { %1998 = vadd.xlane.f32.xlu0 %v1997_v4 }
 0x7b8   :  { %v3186_v5 = vpop.f32.mrf.mxu0 }
 0x7ba   :  { %v2332_v19 = vpop.f32.mrf.mxu0 }
 0x7bc   :  { %v3187_v20 = vpop.f32.mrf.mxu0 }
 0x7be   :  { %v2335_v23 = vpop.f32.mrf.mxu0 }
 0x832   :  { %v1999_v26 = vpop.xlane.xlu0 %1998 }
 0x846   :  { %v3166_v11 = vpop.f32.mrf.mxu1 }
 0x847   :  { %v2341_v21 = vadd.f32 %v3186_v5, %v3166_v11 }
 0x848   :  { %v2236_v22 = vpop.f32.mrf.mxu1 }
 0x849   :  { %2352 = vrot.lane.b32.xlu0 %v2341_v21, %s3455_s5  ;;  %v2333_v27 = vadd.f32 %v2332_v19, %v2236_v22 }
 0x84a   :  { %v3167_v7 = vpop.f32.mrf.mxu1 }
 0x84c   :  { %v2239_v24 = vpop.f32.mrf.mxu1 }
 0x84d   :  { %v2336_v25 = vadd.f32 %v2335_v23, %v2239_v24 }
 0x84f   :  { %2347 = vrot.lane.b32.xlu1 %v2336_v25, %s3456_s23 }
 0x8bb   :  { %v2353_v30 = vpop.permute.xlu0 %2352 }
 0x8c1   :  { %v2348_v28 = vpop.permute.xlu1 %2347 }
 0x8c2   :  { %v2350_v29 = vadd.f32 %v2348_v28, %v2333_v27 }
 0x8c4   :  { %v2355_v31 = vadd.f32 %v2353_v30, %v2350_v29 }
 0x8c6   :  { %v2356_v32 = vadd.f32 %v2355_v31, %v1999_v26 }
 0x8c8   :  { %2359 = vperm.xlu1 %3196, %v2356_v32  }
 0x943   :  { %v2360_v35 = vpop.permute.xlu1 %2359 }
 0x944   :  { %v2366_v36 = vadd.f32 %v2365_v34, %v2360_v35 }
 0x946   :  { %2367 = vst [vmem:[%s3883_s7] sm:$0xff] %v2366_v36 }
 0x947   :  { %2372 = vsyncpa [#allocation4], 1 }

</bundles_post_ra>
